<compile_context>
chip_gen: v6e
topology: v6e:2x2x1
jax: 0.10.0
libtpu: 0.0.40
codegen_flags: <defaults>
</compile_context>

<pallas_src>
import jax
import jax.numpy as jnp
from jax.experimental import pallas as pl
from jax.experimental.pallas import tpu as pltpu


# ----------------------------------------------------------------------------
# Single fused kernel: word self-attention (query + reviews), query projection
# (folded with the review-level reduce projection), review attention, residual.
# ----------------------------------------------------------------------------
def _fused_forward_kernel(qw_ref, urw_ref, w_self_ref, wq_t_ref, bq_ref, m_ref,
                          out_ref):
    """One grid step == one block of Bb batch elements.

    Block shapes:
      qw_ref    : (Bb, W, E)     bf16  query word embeddings
      urw_ref   : (R, Bb, W, E)  bf16  user-review word embeddings (review-major)
      w_self_ref: (1, E)         f32   SelfAttentionLayer.reduce_projection.weight
      wq_t_ref  : (E, E*H)       f32   AttentionLayer.query_projection.weight^T
      bq_ref    : (1, E*H)       f32   AttentionLayer.query_projection.bias
      m_ref     : (E*H, E)       f32   folded .view(B,E,H) + reduce_projection:
                                       M[i*H + h, i] = w_red[h]
      out_ref   : (Bb, E)        f32   personalized model = user_entity + q_emb
    """
    q_words = qw_ref[...].astype(jnp.float32)      # (Bb, W, E)
    ur_words = urw_ref[...].astype(jnp.float32)    # (R, Bb, W, E)
    w_self = w_self_ref[...]                       # (1, E)

    # ---- word-level self attention on the query (softmax over W) ----
    s_q = jnp.tanh(jnp.sum(q_words * w_self[None], axis=-1, keepdims=True))    # (Bb, W, 1)
    s_q = s_q - jnp.max(s_q, axis=1, keepdims=True)
    e_q = jnp.exp(s_q)
    a_q = e_q * pl.reciprocal(jnp.sum(e_q, axis=1, keepdims=True), approx=True)
    q_emb = jnp.sum(a_q * q_words, axis=1)                                      # (Bb, E)

    # ---- word-level self attention on user reviews (softmax over W) ----
    s_u = jnp.tanh(jnp.sum(ur_words * w_self[None, None], axis=-1,
                           keepdims=True))                                      # (R, Bb, W, 1)
    s_u = s_u - jnp.max(s_u, axis=2, keepdims=True)
    e_u = jnp.exp(s_u)
    a_u = e_u * pl.reciprocal(jnp.sum(e_u, axis=2, keepdims=True), approx=True)
    reviews_emb = jnp.sum(a_u * ur_words, axis=2)                               # (R, Bb, E)

    # ---- AttentionLayer query projection, folded with the H->1 reduction ----
    # pq_flat = tanh(q @ Wq^T + b)  (Bb, EH);  v = pq_flat @ M  (Bb, E)
    # v[b, i] = sum_h pq.view(B,E,H)[b,i,h] * w_red[h]   (both matmuls on MXU)
    pq_flat = jnp.tanh(
        jnp.dot(q_emb, wq_t_ref[...], preferred_element_type=jnp.float32)
        + bq_ref[...])                                                          # (Bb, EH)
    v = jnp.dot(pq_flat, m_ref[...], preferred_element_type=jnp.float32)        # (Bb, E)

    # ---- review-level attention: softmax over R (leading axis) ----
    red = jnp.sum(reviews_emb * v[None], axis=-1, keepdims=True)                # (R, Bb, 1)
    red = red - jnp.max(red, axis=0, keepdims=True)
    e_r = jnp.exp(red)
    attn = e_r * pl.reciprocal(jnp.sum(e_r, axis=0, keepdims=True), approx=True)
    user_entity = jnp.sum(attn * reviews_emb, axis=0)                           # (Bb, E)

    out_ref[...] = (user_entity + q_emb).astype(out_ref.dtype)


# ----------------------------------------------------------------------------
# Wrapper (JAX glue: embedding gather, layout prep, pallas_call plumbing).
# ----------------------------------------------------------------------------
def _forward_test(params, user_reviews_words, query, *, block_b=8):
    emb_f32 = params["word_embedding"]                           # (V, E)
    B, R, W = user_reviews_words.shape
    E = emb_f32.shape[1]
    H = params["attn_reduce_w"].shape[1]
    EH = E * H

    # bf16 gathered embeddings halve the dominant HBM traffic; all in-kernel
    # math / accumulation stays f32.
    emb = emb_f32.astype(jnp.bfloat16)

    # Pad the batch to a multiple of the per-step block.  Padding word id 0 is
    # the zero embedding, so padded rows stay finite and are sliced off below.
    Bb = int(block_b)
    B_pad = pl.cdiv(B, Bb) * Bb
    if B_pad != B:
        pad = B_pad - B
        query = jnp.pad(query, ((0, pad), (0, 0)))
        user_reviews_words = jnp.pad(user_reviews_words,
                                     ((0, pad), (0, 0), (0, 0)))

    # Embedding gathers (plain-JAX glue).  Reviews are laid out review-major
    # (R, B, W, E) so the kernel's review softmax reduces a leading axis and
    # the per-batch vector `v` broadcasts with no relayout.
    # TODO(synk): for production vocab sizes, gather in-kernel instead
    # (memory_space=pl.ANY + per-row DMA) to avoid materializing (R,B,W,E).
    qw_emb = jnp.take(emb, query, axis=0)                                   # (B_pad, W, E)
    urw_emb = jnp.take(emb, jnp.transpose(user_reviews_words, (1, 0, 2)),
                       axis=0)                                              # (R, B_pad, W, E)

    w_self = params["self_reduce_w"].astype(jnp.float32)                    # (1, E)
    wq_t = params["query_proj_w"].T.astype(jnp.float32)                     # (E, EH)
    bq = params["query_proj_b"][None, :].astype(jnp.float32)                # (1, EH)
    # M[i*H + h, i] = w_red[0, h]  -- implements .view(B,E,H) + reduce_projection.
    m = jnp.kron(jnp.eye(E, dtype=jnp.float32),
                 params["attn_reduce_w"].T.astype(jnp.float32))             # (EH, E)

    out = pl.pallas_call(
        _fused_forward_kernel,
        out_shape=jax.ShapeDtypeStruct((B_pad, E), jnp.float32),
        grid=(B_pad // Bb,),
        in_specs=[
            pl.BlockSpec((Bb, W, E), lambda i: (i, 0, 0)),
            pl.BlockSpec((R, Bb, W, E), lambda i: (0, i, 0, 0)),
            pl.BlockSpec((1, E), lambda i: (0, 0)),
            pl.BlockSpec((E, EH), lambda i: (0, 0)),
            pl.BlockSpec((1, EH), lambda i: (0, 0)),
            pl.BlockSpec((EH, E), lambda i: (0, 0)),
        ],
        out_specs=pl.BlockSpec((Bb, E), lambda i: (i, 0)),
        # For production (large E*H) also set vmem_limit_bytes and/or tile the
        # EH axis of wq_t/m with an extra "arbitrary" grid axis (v7x: 64 MiB).
        compiler_params=pltpu.CompilerParams(
            dimension_semantics=("parallel",)),
    )(qw_emb, urw_emb, w_self, wq_t, bq, m)
    return out[:B]


_forward_test_jit = jax.jit(_forward_test, static_argnames=("block_b",))


def model_forward(params, users, user_reviews_words, items, item_reviews_words,
                  query, mode="test"):
    # `users`, `items`, `item_reviews_words` are unused by the reference
    # forward in 'test' mode.
    if mode != "test":
        # TODO(synk): 'train' mode needs hem_loss (not defined in the reference
        # module); 'output_embedding' mode is omitted here.
        raise NotImplementedError(mode)
    return _forward_test_jit(params, user_reviews_words, query)


# ----------------------------------------------------------------------------
# Deterministic parameter init (mirrors Model.reset_parameters).
# ----------------------------------------------------------------------------
def init_params(key, word_num, embedding_size, hidden_dim):
    k1, k2, k3, k4, k5 = jax.random.split(key, 5)

    def xavier_normal(k, shape):
        fan_out, fan_in = shape
        std = (2.0 / (fan_in + fan_out)) ** 0.5
        return std * jax.random.normal(k, shape, jnp.float32)

    word_emb = jax.random.uniform(k1, (word_num, embedding_size),
                                  jnp.float32, 0.0, 0.1)
    word_emb = word_emb.at[0].set(0.0)  # padding_idx = 0

    return dict(
        word_embedding=word_emb,
        self_reduce_w=xavier_normal(k2, (1, embedding_size)),
        query_proj_w=xavier_normal(k3, (embedding_size * hidden_dim, embedding_size)),
        query_proj_b=jax.random.uniform(k4, (embedding_size * hidden_dim,),
                                        jnp.float32, 0.0, 0.01),
        attn_reduce_w=xavier_normal(k5, (1, hidden_dim)),
    )


# ----------------------------------------------------------------------------
# Pure-JAX reference (mirrors the PyTorch forward) for a correctness check.
# ----------------------------------------------------------------------------
def reference_forward(params, user_reviews_words, query):
    emb = params["word_embedding"]

    def embed(words):  # (..., W) int -> (..., E)
        we = jnp.take(emb, words, axis=0)
        s = jnp.tanh(jnp.einsum('...we,oe->...wo', we, params["self_reduce_w"]))
        w = jax.nn.softmax(s, axis=-2)
        return jnp.sum(w * we, axis=-2)

    q_emb = embed(query[:, None, :])[:, 0]                 # (B, E)
    reviews = embed(user_reviews_words)                    # (B, R, E)
    B, E = q_emb.shape
    H = params["attn_reduce_w"].shape[1]
    pq = jnp.tanh(q_emb @ params["query_proj_w"].T + params["query_proj_b"])
    pq = pq.reshape(B, E, H)
    dotted = jnp.einsum('bri,bih->brh', reviews, pq)
    red = jnp.einsum('brh,oh->bro', dotted, params["attn_reduce_w"])
    w = jax.nn.softmax(red, axis=1)
    user_entity = jnp.sum(w * reviews, axis=1)
    return user_entity + q_emb


if __name__ == "__main__":
    B, R, W, V, E, H = 2, 4, 8, 50, 32, 16
    key = jax.random.PRNGKey(0)
    pkey, dkey = jax.random.split(key)
    params = init_params(pkey, V, E, H)

    k1, k2, k3 = jax.random.split(dkey, 3)
    users = jnp.arange(B, dtype=jnp.int32)                                   # unused in 'test'
    items = jnp.arange(B, dtype=jnp.int32)                                   # unused in 'test'
    user_reviews_words = jax.random.randint(k1, (B, R, W), 0, V, dtype=jnp.int32)
    item_reviews_words = jax.random.randint(k2, (B, R, W), 0, V, dtype=jnp.int32)  # unused in 'test'
    query = jax.random.randint(k3, (B, W), 0, V, dtype=jnp.int32)

    out = model_forward(params, users, user_reviews_words, items,
                        item_reviews_words, query, mode="test")
    out = jax.block_until_ready(out)

    ref = reference_forward(params, user_reviews_words, query)
    assert out.shape == (B, E), out.shape
    assert jnp.allclose(out, ref, atol=1e-2, rtol=1e-2), (out, ref)
    print("KERNEL_OK")
</pallas_src>

<mosaic_0001>
module attributes {stable_mosaic.version = 11 : i64} {
  func.func @_fused_forward_kernel(%arg0: i32, %arg1: memref<8x8x32xbf16, #tpu.memory_space<vmem>>, %arg2: memref<4x8x8x32xbf16, #tpu.memory_space<vmem>>, %arg3: memref<1x32xf32, #tpu.memory_space<vmem>>, %arg4: memref<32x512xf32, #tpu.memory_space<vmem>>, %arg5: memref<1x512xf32, #tpu.memory_space<vmem>>, %arg6: memref<512x32xf32, #tpu.memory_space<vmem>>, %arg7: memref<8x32xf32, #tpu.memory_space<vmem>>) attributes {dimension_semantics = [#tpu.dimension_semantics<parallel>], iteration_bounds = array<i64: 1>, scalar_prefetch = 0 : i64, scratch_operands = 0 : i64, tpu.core_type = #tpu.core_type<tc>, window_params = [{transform_indices = @transform_0, window_bounds = array<i64: 8, 8, 32>}, {transform_indices = @transform_1, window_bounds = array<i64: 4, 8, 8, 32>}, {pipeline_mode = #tpu.pipeline_mode<synchronous>, transform_indices = @transform_2, window_bounds = array<i64: 1, 32>}, {pipeline_mode = #tpu.pipeline_mode<synchronous>, transform_indices = @transform_3, window_bounds = array<i64: 32, 512>}, {pipeline_mode = #tpu.pipeline_mode<synchronous>, transform_indices = @transform_4, window_bounds = array<i64: 1, 512>}, {pipeline_mode = #tpu.pipeline_mode<synchronous>, transform_indices = @transform_5, window_bounds = array<i64: 512, 32>}, {transform_indices = @transform_6, window_bounds = array<i64: 8, 32>}]} {
    %c0 = arith.constant 0 : index
    %c0_0 = arith.constant 0 : index
    %c0_1 = arith.constant 0 : index
    %0 = vector.load %arg1[%c0, %c0_0, %c0_1] : memref<8x8x32xbf16, #tpu.memory_space<vmem>>, vector<8x8x32xbf16>
    %1 = arith.extf %0 : vector<8x8x32xbf16> to vector<8x8x32xf32>
    %c0_2 = arith.constant 0 : index
    %c0_3 = arith.constant 0 : index
    %c0_4 = arith.constant 0 : index
    %c0_5 = arith.constant 0 : index
    %2 = vector.load %arg2[%c0_2, %c0_3, %c0_4, %c0_5] : memref<4x8x8x32xbf16, #tpu.memory_space<vmem>>, vector<4x8x8x32xbf16>
    %3 = arith.extf %2 : vector<4x8x8x32xbf16> to vector<4x8x8x32xf32>
    %c0_6 = arith.constant 0 : index
    %c0_7 = arith.constant 0 : index
    %4 = vector.load %arg3[%c0_6, %c0_7] : memref<1x32xf32, #tpu.memory_space<vmem>>, vector<1x32xf32>
    %5 = vector.shape_cast %4 : vector<1x32xf32> to vector<1x1x32xf32>
    %6 = vector.broadcast %5 : vector<1x1x32xf32> to vector<8x8x32xf32>
    %7 = arith.mulf %1, %6 : vector<8x8x32xf32>
    %cst = arith.constant dense<0.000000e+00> : vector<8x8xf32>
    %8 = vector.multi_reduction <add>, %7, %cst [2] : vector<8x8x32xf32> to vector<8x8xf32>
    %9 = vector.shape_cast %8 : vector<8x8xf32> to vector<8x8x1xf32>
    %10 = math.tanh %9 : vector<8x8x1xf32>
    %cst_8 = arith.constant dense<0xFF800000> : vector<8x1xf32>
    %11 = vector.multi_reduction <maximumf>, %10, %cst_8 [1] : vector<8x8x1xf32> to vector<8x1xf32>
    %12 = vector.shape_cast %11 : vector<8x1xf32> to vector<8x1x1xf32>
    %13 = vector.broadcast %12 : vector<8x1x1xf32> to vector<8x8x1xf32>
    %14 = arith.subf %10, %13 : vector<8x8x1xf32>
    %15 = math.exp %14 : vector<8x8x1xf32>
    %cst_9 = arith.constant dense<0.000000e+00> : vector<8x1xf32>
    %16 = vector.multi_reduction <add>, %15, %cst_9 [1] : vector<8x8x1xf32> to vector<8x1xf32>
    %17 = vector.shape_cast %16 : vector<8x1xf32> to vector<8x1x1xf32>
    %18 = tpu.reciprocal %17 {approx = true} : vector<8x1x1xf32> -> vector<8x1x1xf32>
    %19 = vector.broadcast %18 : vector<8x1x1xf32> to vector<8x8x1xf32>
    %20 = arith.mulf %15, %19 : vector<8x8x1xf32>
    %21 = vector.broadcast %20 : vector<8x8x1xf32> to vector<8x8x32xf32>
    %22 = arith.mulf %21, %1 : vector<8x8x32xf32>
    %cst_10 = arith.constant dense<0.000000e+00> : vector<8x32xf32>
    %23 = vector.multi_reduction <add>, %22, %cst_10 [1] : vector<8x8x32xf32> to vector<8x32xf32>
    %24 = vector.shape_cast %4 : vector<1x32xf32> to vector<1x1x1x32xf32>
    %25 = vector.broadcast %24 : vector<1x1x1x32xf32> to vector<4x8x8x32xf32>
    %26 = arith.mulf %3, %25 : vector<4x8x8x32xf32>
    %cst_11 = arith.constant dense<0.000000e+00> : vector<4x8x8xf32>
    %27 = vector.multi_reduction <add>, %26, %cst_11 [3] : vector<4x8x8x32xf32> to vector<4x8x8xf32>
    %28 = vector.shape_cast %27 : vector<4x8x8xf32> to vector<4x8x8x1xf32>
    %29 = math.tanh %28 : vector<4x8x8x1xf32>
    %cst_12 = arith.constant dense<0xFF800000> : vector<4x8x1xf32>
    %30 = vector.multi_reduction <maximumf>, %29, %cst_12 [2] : vector<4x8x8x1xf32> to vector<4x8x1xf32>
    %31 = vector.shape_cast %30 : vector<4x8x1xf32> to vector<4x8x1x1xf32>
    %32 = vector.broadcast %31 : vector<4x8x1x1xf32> to vector<4x8x8x1xf32>
    %33 = arith.subf %29, %32 : vector<4x8x8x1xf32>
    %34 = math.exp %33 : vector<4x8x8x1xf32>
    %cst_13 = arith.constant dense<0.000000e+00> : vector<4x8x1xf32>
    %35 = vector.multi_reduction <add>, %34, %cst_13 [2] : vector<4x8x8x1xf32> to vector<4x8x1xf32>
    %36 = vector.shape_cast %35 : vector<4x8x1xf32> to vector<4x8x1x1xf32>
    %37 = tpu.reciprocal %36 {approx = true} : vector<4x8x1x1xf32> -> vector<4x8x1x1xf32>
    %38 = vector.broadcast %37 : vector<4x8x1x1xf32> to vector<4x8x8x1xf32>
    %39 = arith.mulf %34, %38 : vector<4x8x8x1xf32>
    %40 = vector.broadcast %39 : vector<4x8x8x1xf32> to vector<4x8x8x32xf32>
    %41 = arith.mulf %40, %3 : vector<4x8x8x32xf32>
    %cst_14 = arith.constant dense<0.000000e+00> : vector<4x8x32xf32>
    %42 = vector.multi_reduction <add>, %41, %cst_14 [2] : vector<4x8x8x32xf32> to vector<4x8x32xf32>
    %c0_15 = arith.constant 0 : index
    %c0_16 = arith.constant 0 : index
    %43 = vector.load %arg4[%c0_15, %c0_16] : memref<32x512xf32, #tpu.memory_space<vmem>>, vector<32x512xf32>
    %cst_17 = arith.constant dense<0.000000e+00> : vector<8x512xf32>
    %44 = tpu.matmul %23, %43, %cst_17 {dimension_numbers = #tpu.dot_dimension_numbers<[1], [0], [0], [1], [0, 0, 1, 1], [], []>} : vector<8x32xf32>, vector<32x512xf32>, vector<8x512xf32> -> vector<8x512xf32>
    %c0_18 = arith.constant 0 : index
    %c0_19 = arith.constant 0 : index
    %45 = vector.load %arg5[%c0_18, %c0_19] : memref<1x512xf32, #tpu.memory_space<vmem>>, vector<1x512xf32>
    %46 = vector.broadcast %45 : vector<1x512xf32> to vector<8x512xf32>
    %47 = arith.addf %44, %46 : vector<8x512xf32>
    %48 = math.tanh %47 : vector<8x512xf32>
    %c0_20 = arith.constant 0 : index
    %c0_21 = arith.constant 0 : index
    %49 = vector.load %arg6[%c0_20, %c0_21] : memref<512x32xf32, #tpu.memory_space<vmem>>, vector<512x32xf32>
    %cst_22 = arith.constant dense<0.000000e+00> : vector<8x32xf32>
    %50 = tpu.matmul %48, %49, %cst_22 {dimension_numbers = #tpu.dot_dimension_numbers<[1], [0], [0], [1], [0, 0, 1, 1], [], []>} : vector<8x512xf32>, vector<512x32xf32>, vector<8x32xf32> -> vector<8x32xf32>
    %51 = vector.shape_cast %50 : vector<8x32xf32> to vector<1x8x32xf32>
    %52 = vector.broadcast %51 : vector<1x8x32xf32> to vector<4x8x32xf32>
    %53 = arith.mulf %42, %52 : vector<4x8x32xf32>
    %cst_23 = arith.constant dense<0.000000e+00> : vector<4x8xf32>
    %54 = vector.multi_reduction <add>, %53, %cst_23 [2] : vector<4x8x32xf32> to vector<4x8xf32>
    %55 = vector.shape_cast %54 : vector<4x8xf32> to vector<4x8x1xf32>
    %cst_24 = arith.constant dense<0xFF800000> : vector<8x1xf32>
    %56 = vector.multi_reduction <maximumf>, %55, %cst_24 [0] : vector<4x8x1xf32> to vector<8x1xf32>
    %57 = vector.shape_cast %56 : vector<8x1xf32> to vector<1x8x1xf32>
    %58 = vector.broadcast %57 : vector<1x8x1xf32> to vector<4x8x1xf32>
    %59 = arith.subf %55, %58 : vector<4x8x1xf32>
    %60 = math.exp %59 : vector<4x8x1xf32>
    %cst_25 = arith.constant dense<0.000000e+00> : vector<8x1xf32>
    %61 = vector.multi_reduction <add>, %60, %cst_25 [0] : vector<4x8x1xf32> to vector<8x1xf32>
    %62 = vector.shape_cast %61 : vector<8x1xf32> to vector<1x8x1xf32>
    %63 = tpu.reciprocal %62 {approx = true} : vector<1x8x1xf32> -> vector<1x8x1xf32>
    %64 = vector.broadcast %63 : vector<1x8x1xf32> to vector<4x8x1xf32>
    %65 = arith.mulf %60, %64 : vector<4x8x1xf32>
    %66 = vector.broadcast %65 : vector<4x8x1xf32> to vector<4x8x32xf32>
    %67 = arith.mulf %66, %42 : vector<4x8x32xf32>
    %cst_26 = arith.constant dense<0.000000e+00> : vector<8x32xf32>
    %68 = vector.multi_reduction <add>, %67, %cst_26 [0] : vector<4x8x32xf32> to vector<8x32xf32>
    %69 = arith.addf %68, %23 : vector<8x32xf32>
    %c0_27 = arith.constant 0 : index
    %c0_28 = arith.constant 0 : index
    %70 = vector.load %arg7[%c0_27, %c0_28] : memref<8x32xf32, #tpu.memory_space<vmem>>, vector<8x32xf32>
    tpu.vector_store %arg7[%c0_27, %c0_28], %69 {strides = array<i32>} : memref<8x32xf32, #tpu.memory_space<vmem>>, vector<8x32xf32>,
    return
  }
  func.func @transform_0(%arg0: i32) -> (i32, i32, i32) {
    %c0_i32 = arith.constant 0 : i32
    %c0_i32_0 = arith.constant 0 : i32
    %c0_i32_1 = arith.constant 0 : i32
    return %arg0, %c0_i32, %c0_i32_0 : i32, i32, i32
  }
  func.func @transform_1(%arg0: i32) -> (i32, i32, i32, i32) {
    %c0_i32 = arith.constant 0 : i32
    %c0_i32_0 = arith.constant 0 : i32
    %c0_i32_1 = arith.constant 0 : i32
    %c0_i32_2 = arith.constant 0 : i32
    return %c0_i32, %arg0, %c0_i32_0, %c0_i32_1 : i32, i32, i32, i32
  }
  func.func @transform_2(%arg0: i32) -> (i32, i32) {
    %c0_i32 = arith.constant 0 : i32
    %c0_i32_0 = arith.constant 0 : i32
    %c0_i32_1 = arith.constant 0 : i32
    return %c0_i32, %c0_i32_0 : i32, i32
  }
  func.func @transform_3(%arg0: i32) -> (i32, i32) {
    %c0_i32 = arith.constant 0 : i32
    %c0_i32_0 = arith.constant 0 : i32
    %c0_i32_1 = arith.constant 0 : i32
    return %c0_i32, %c0_i32_0 : i32, i32
  }
  func.func @transform_4(%arg0: i32) -> (i32, i32) {
    %c0_i32 = arith.constant 0 : i32
    %c0_i32_0 = arith.constant 0 : i32
    %c0_i32_1 = arith.constant 0 : i32
    return %c0_i32, %c0_i32_0 : i32, i32
  }
  func.func @transform_5(%arg0: i32) -> (i32, i32) {
    %c0_i32 = arith.constant 0 : i32
    %c0_i32_0 = arith.constant 0 : i32
    %c0_i32_1 = arith.constant 0 : i32
    return %c0_i32, %c0_i32_0 : i32, i32
  }
  func.func @transform_6(%arg0: i32) -> (i32, i32) {
    %c0_i32 = arith.constant 0 : i32
    %c0_i32_0 = arith.constant 0 : i32
    return %arg0, %c0_i32 : i32, i32
  }
}

</mosaic_0001>

<bundles_post_ra>
// kernel: _forward_test.1
= control target key start
LH: loop header
LB: loop body
LE: loop exit
PB: predicated region body
PF: predicated region fallthrough
CT: control target
= control target key end

     0   :  { %vm118_vm0 = vcmask 261120   ;;  %v2410_v32 = vmov 0.0   ;;  %vm1357_vm1 = vcmask 1041409   ;;  %vm1359_vm2 = vcmask 1042434   ;;  %s3891_s0 = inlined_call_operand.vmem [shape: bf16[8,8,32], index: 0, kind: input, shape index: {}]   ;;  %s3892_s2 = inlined_call_operand.vmem [shape: f32[1,32], index: 2, kind: input, shape index: {}]   ;;  %s3893_s3 = inlined_call_operand.vmem [shape: f32[32,512], index: 3, kind: input, shape index: {}]   ;;  %s3894_s1 = inlined_call_operand.vmem [shape: bf16[4,8,8,32], index: 1, kind: input, shape index: {}]   ;;  %s3895_s5 = inlined_call_operand.vmem [shape: f32[512,32], index: 5, kind: input, shape index: {}]   ;;  %s3896_s4 = inlined_call_operand.vmem [shape: f32[1,512], index: 4, kind: input, shape index: {}]   ;;  %s3897_s6 = inlined_call_operand.vmem [shape: f32[8,32], index: 6, kind: output, shape index: {}]  }
   0x1   :  { %v2449_v0 = vld [vmem:[%s3891_s0 + $0x8] sm:$0xff]   ;;  %v2454_v1 = vld [vmem:[%s3892_s2] ss:$0 sm:$0xff]  ;;  %v2468_v7 = vld [vmem:[%s3891_s0 + $0x10] sm:$0xff]   ;;  %1437 = vmatprep.mubr.f32.mxu0 %v2410_v32  ;;  %1508 = vmatprep.mubr.f32.mxu1 %v2410_v32  ;;  %vm1361_vm3 = vcmask 1043459   ;;  %vm1363_vm4 = vcmask 1044484  }
   0x2   :  { %v2459_v2 = vld [vmem:[%s3891_s0] sm:$0xff]   ;;  %v1989_v3 = vunpack.c.l.bf16 %v2449_v0  ;;  %v1990_v5 = vunpack.c.h.bf16 %v2449_v0  ;;  %v3932_v8 = vunpack.c.h.bf16 %v2468_v7  ;;  %v3931_v9 = vunpack.c.l.bf16 %v2468_v7  ;;  %v2487_v14 = vld [vmem:[%s3891_s0 + $0x18] sm:$0xff]   ;;  %v1324_v29 = vld [vmem:[%s3893_s3 + $0x68] sm:$0xff] }
   0x3   :  { %v1985_v4 = vunpack.c.l.bf16 %v2459_v2  ;;  %v1986_v6 = vunpack.c.h.bf16 %v2459_v2  ;;  %v3929_v17 = vunpack.c.h.bf16 %v2487_v14  ;;  %v3928_v18 = vunpack.c.l.bf16 %v2487_v14  ;;  %v1326_v30 = vld [vmem:[%s3893_s3 + $0x78] sm:$0xff]  ;;  %v1323_v31 = vld [vmem:[%s3893_s3 + $0x60] sm:$0xff]  ;;  %1397 = vmatprep.subr.mxu0 %v1324_v29  ;;  %v1325_v33 = vld [vmem:[%s3893_s3 + $0x70] sm:$0xff] }
   0x4   :  { %v112_v10 = vmul.f32 %v1989_v3, %v2454_v1  ;;  %v113_v12 = vmul.f32 %v1990_v5, %v2454_v1  ;;  %v115_v21 = vmul.f32 %v3932_v8, %v2454_v1  ;;  %v114_v22 = vmul.f32 %v3931_v9, %v2454_v1  ;;  %1468 = vmatprep.subr.mxu1 %v1326_v30  ;;  %v1320_v34 = vld [vmem:[%s3893_s3 + $0x48] sm:$0xff]  ;;  %v1322_v35 = vld [vmem:[%s3893_s3 + $0x58] sm:$0xff]  ;;  %v1319_v36 = vld [vmem:[%s3893_s3 + $0x40] sm:$0xff] }
   0x5   :  { %v110_v11 = vmul.f32 %v1985_v4, %v2454_v1  ;;  %v111_v13 = vmul.f32 %v1986_v6, %v2454_v1  ;;  %v117_v25 = vmul.f32 %v3929_v17, %v2454_v1  ;;  %v116_v26 = vmul.f32 %v3928_v18, %v2454_v1  ;;  %1398 = vmatpush1.msra.mxu0 %v1323_v31  ;;  %v1321_v37 = vld [vmem:[%s3893_s3 + $0x50] sm:$0xff]  ;;  %v1316_v38 = vld [vmem:[%s3893_s3 + $0x28] sm:$0xff]  ;;  %v1318_v39 = vld [vmem:[%s3893_s3 + $0x38] sm:$0xff] }
   0x6   :  { %v125_v15 = vsel %vm118_vm0, %v112_v10, 0.0  ;;  %v128_v19 = vsel %vm118_vm0, %v113_v12, 0.0  ;;  %v134_v23 = vsel %vm118_vm0, %v115_v21, 0.0  ;;  %v131_v24 = vsel %vm118_vm0, %v114_v22, 0.0  ;;  %1469 = vmatpush1.msra.mxu1 %v1325_v33  ;;  %1399 = vmatprep.subr.mxu0 %v1320_v34  ;;  %v1315_v40 = vld [vmem:[%s3893_s3 + $0x20] sm:$0xff]  ;;  %v1317_v41 = vld [vmem:[%s3893_s3 + $0x30] sm:$0xff] }
   0x7   :  { %v119_v16 = vsel %vm118_vm0, %v110_v11, 0.0  ;;  %126 = vadd.xlane.f32.xlu1 %v125_v15  ;;  %v122_v20 = vsel %vm118_vm0, %v111_v13, 0.0  ;;  %v140_v27 = vsel %vm118_vm0, %v117_v25, 0.0  ;;  %v137_v28 = vsel %vm118_vm0, %v116_v26, 0.0  ;;  %1470 = vmatprep.subr.mxu1 %v1322_v35  ;;  %v1312_v42 = vld [vmem:[%s3893_s3 + $0x8] sm:$0xff]  ;;  %v1314_v43 = vld [vmem:[%s3893_s3 + $0x18] sm:$0xff] }
   0x8   :  { %120 = vadd.xlane.f32.xlu0 %v119_v16  ;;  %1400 = vmatpush1.msra.mxu0 %v1319_v36  ;;  %v1311_v44 = vld [vmem:[%s3893_s3] sm:$0xff]  ;;  %v1313_v45 = vld [vmem:[%s3893_s3 + $0x10] sm:$0xff]  ;;  %v2585_v53 = vld [vmem:[%s3894_s1 + $0x28] sm:$0xff]   ;;  %v3982_v0 = vunpack.c.h.bf16 %v2468_v7  ;;  %vm1365_vm5 = vcmask 1045509   ;;  %vm1367_vm6 = vcmask 1046534   ;;  %vm1369_vm7 = vcmask 1047559  }
   0x9   :  { %1471 = vmatpush1.msra.mxu1 %v1321_v37  ;;  %1401 = vmatprep.subr.mxu0 %v1316_v38  ;;  %v2562_v46 = vld [vmem:[%s3894_s1 + $0x20] sm:$0xff]   ;;  %v2590_v54 = vld [vmem:[%s3894_s1 + $0x8] sm:$0xff]   ;;  %v3925_v56 = vunpack.c.l.bf16 %v2585_v53  ;;  %v1550_v12 = vld [vmem:[%s3895_s5 + $0xf8] sm:$0xff]  ;;  %v3924_v33 = vunpack.c.h.bf16 %v2585_v53 }
   0xa   :  { %1472 = vmatprep.subr.mxu1 %v1318_v39  ;;  %1402 = vmatpush1.msra.mxu0 %v1315_v40  ;;  %v2567_v47 = vld [vmem:[%s3894_s1] sm:$0xff]   ;;  %v3926_v49 = vunpack.c.h.bf16 %v2562_v46  ;;  %v3914_v60 = vunpack.c.l.bf16 %v2590_v54  ;;  %v2607_v61 = vld [vmem:[%s3894_s1 + $0x68] sm:$0xff]   ;;  %v1582_v13 = vld [vmem:[%s3895_s5 + $0x1f8] sm:$0xff]  ;;  %v3927_v34 = vunpack.c.l.bf16 %v2562_v46 }
   0xb   :  { %129 = vadd.xlane.f32.xlu1 %v128_v19  ;;  %1473 = vmatpush1.msra.mxu1 %v1317_v41  ;;  %v2572_v48 = vld [vmem:[%s3894_s1 + $0x60] sm:$0xff]   ;;  %v3915_v50 = vunpack.c.h.bf16 %v2567_v47  ;;  %3974 = vst [vmem:[#allocation4_spill] sm:$0xff] %v2607_v61  ;;  %v2615_v63 = vld [vmem:[%s3894_s1 + $0x48] sm:$0xff]   ;;  %v361_v15 = vmul.f32 %v3925_v56, %v2454_v1  ;;  %v3906_v16 = vunpack.c.l.bf16 %v2607_v61  ;;  %v362_v39 = vmul.f32 %v3924_v33, %v2454_v1 }
   0xc   :  { %123 = vadd.xlane.f32.xlu0 %v122_v20  ;;  %1403 = vmatprep.subr.mxu0 %v1312_v42  ;;  %3972 = vst [vmem:[#allocation2_spill] sm:$0xff] %v2572_v48  ;;  %v3908_v51 = vunpack.c.h.bf16 %v2572_v48  ;;  %v2580_v52 = vld [vmem:[%s3894_s1 + $0x40] sm:$0xff]   ;;  %v360_v57 = vmul.f32 %v3926_v49, %v2454_v1  ;;  %3975 = vst [vmem:[#allocation5_spill] sm:$0xff] %v2615_v63  ;;  %v353_v21 = vmul.f32 %v3914_v60, %v2454_v1 }
   0xd   :  { %1474 = vmatprep.subr.mxu1 %v1314_v43  ;;  %1404 = vmatpush1.msra.mxu0 %v1311_v44  ;;  %3973 = vst [vmem:[#allocation3_spill] sm:$0xff] %v2580_v52  ;;  %v3901_v55 = vunpack.c.h.bf16 %v2580_v52  ;;  %v352_v58 = vmul.f32 %v3915_v50, %v2454_v1  ;;  %v3900_v22 = vunpack.c.l.bf16 %v2615_v63  ;;  %v413_v25 = vsel %vm118_vm0, %v361_v15, 0.0 }
   0xe   :  { %1475 = vmatpush1.msra.mxu1 %v1313_v45  ;;  %v376_v59 = vmul.f32 %v3908_v51, %v2454_v1  ;;  %v410_v10 = vsel %vm118_vm0, %v360_v57, 0.0  ;;  %2081 = vmatprep.subr.mxu0 %v1550_v12  ;;  %v389_v26 = vsel %vm118_vm0, %v353_v21, 0.0  ;;  %v3899_v35 = vunpack.c.h.bf16 %v2615_v63  ;;  %v2698_v21 = vld [vmem:[%s3894_s1 + $0x70] sm:$0xff]  }
   0xf   :  { %135 = vadd.xlane.f32.xlu1 %v134_v23  ;;  %v368_v62 = vmul.f32 %v3901_v55, %v2454_v1  ;;  %v386_v11 = vsel %vm118_vm0, %v352_v58, 0.0  ;;  %2116 = vmatprep.subr.mxu1 %v1582_v13  ;;  %v377_v23 = vmul.f32 %v3906_v16, %v2454_v1  ;;  %v3902_v36 = vunpack.c.l.bf16 %v2580_v52  ;;  %v2678_v58 = vld [vmem:[%s3894_s1 + $0x30] sm:$0xff]   ;;  %3977 = vst [vmem:[#allocation7_spill] sm:$0xff] %v2698_v21 }
  0x10   :  { %132 = vadd.xlane.f32.xlu0 %v131_v24  ;;  %v458_v19 = vsel %vm118_vm0, %v376_v59, 0.0  ;;  %v3912_v24 = vunpack.c.h.bf16 %v2590_v54  ;;  %v359_v40 = vmul.f32 %v3927_v34, %v2454_v1  ;;  %v370_v41 = vmul.f32 %v3899_v35, %v2454_v1 }
  0x11   :  { %v434_v20 = vsel %vm118_vm0, %v368_v62, 0.0  ;;  %v461_v29 = vsel %vm118_vm0, %v377_v23, 0.0  ;;  %v3905_v42 = vunpack.c.h.bf16 %v2607_v61  ;;  %v416_v43 = vsel %vm118_vm0, %v362_v39, 0.0 }
  0x12   :  { %v354_v30 = vmul.f32 %v3912_v24, %v2454_v1  ;;  %v407_v44 = vsel %vm118_vm0, %v359_v40, 0.0  ;;  %v367_v45 = vmul.f32 %v3902_v36, %v2454_v1  ;;  %v3909_v57 = vunpack.c.l.bf16 %v2572_v48 }
  0x13   :  { %141 = vadd.xlane.f32.xlu1 %v140_v27  ;;  %v369_v27 = vmul.f32 %v3900_v22, %v2454_v1  ;;  %v3922_v12 = vunpack.c.l.bf16 %v2678_v58  ;;  %v440_v13 = vsel %vm118_vm0, %v370_v41, 0.0  ;;  %v3920_v40 = vunpack.c.h.bf16 %v2678_v58  ;;  %v2719_v41 = vld [vmem:[%s3894_s1 + $0x38] sm:$0xff]  }
  0x14   :  { %138 = vadd.xlane.f32.xlu0 %v137_v28  ;;  %v3916_v28 = vunpack.c.l.bf16 %v2567_v47  ;;  %v392_v37 = vsel %vm118_vm0, %v354_v30, 0.0  ;;  %v431_v15 = vsel %vm118_vm0, %v367_v45, 0.0 }
  0x15   :  { %v437_v31 = vsel %vm118_vm0, %v369_v27, 0.0  ;;  %v363_v27 = vmul.f32 %v3922_v12, %v2454_v1 }
  0x16   :  { %v351_v32 = vmul.f32 %v3916_v28, %v2454_v1 }
  0x17   :  { %411 = vadd.xlane.f32.xlu1 %v410_v10  ;;  %v2683_v10 = vld [vmem:[%s3894_s1 + $0x10] sm:$0xff]  }
  0x18   :  { %387 = vadd.xlane.f32.xlu0 %v386_v11  ;;  %v383_v38 = vsel %vm118_vm0, %v351_v32, 0.0  ;;  %3976 = vst [vmem:[#allocation6_spill] sm:$0xff] %v2683_v10  ;;  %v378_v11 = vmul.f32 %v3905_v42, %v2454_v1  ;;  %v3921_v42 = vunpack.c.h.bf16 %v2719_v41 }
  0x1a   :  { %v464_v30 = vsel %vm118_vm0, %v378_v11, 0.0 }
  0x1b   :  { %459 = vadd.xlane.f32.xlu1 %v458_v19  ;;  %v375_v19 = vmul.f32 %v3909_v57, %v2454_v1 }
  0x1c   :  { %435 = vadd.xlane.f32.xlu0 %v434_v20  ;;  %v3911_v20 = vunpack.c.l.bf16 %v2683_v10 }
  0x1e   :  { %v355_v32 = vmul.f32 %v3911_v20, %v2454_v1 }
  0x1f   :  { %414 = vadd.xlane.f32.xlu1 %v413_v25 }
  0x20   :  { %390 = vadd.xlane.f32.xlu0 %v389_v26  ;;  %v2703_v26 = vld [vmem:[%s3894_s1 + $0x50] sm:$0xff]  }
  0x21   :  { %3978 = vst [vmem:[#allocation8_spill] sm:$0xff] %v2703_v26 }
  0x23   :  { %462 = vadd.xlane.f32.xlu1 %v461_v29  ;;  %v3904_v29 = vunpack.c.l.bf16 %v2698_v21 }
  0x24   :  { %438 = vadd.xlane.f32.xlu0 %v437_v31  ;;  %v455_v31 = vsel %vm118_vm0, %v375_v19, 0.0  ;;  %v2736_v19 = vld [vmem:[%s3894_s1 + $0x18] sm:$0xff]  }
  0x25   :  { %v379_v45 = vmul.f32 %v3904_v29, %v2454_v1  ;;  %3979 = vst [vmem:[#allocation9_spill] sm:$0xff] %v2736_v19 }
  0x27   :  { %393 = vadd.xlane.f32.xlu1 %v392_v37  ;;  %v3898_v37 = vunpack.c.l.bf16 %v2703_v26 }
  0x28   :  { %384 = vadd.xlane.f32.xlu0 %v383_v38 }
  0x29   :  { %v371_v11 = vmul.f32 %v3898_v37, %v2454_v1  ;;  %v2759_v37 = vld [vmem:[%s3894_s1 + $0x58] sm:$0xff]  }
  0x2a   :  { %3981 = vst [vmem:[#allocation11_spill] sm:$0xff] %v2759_v37 }
  0x2b   :  { %417 = vadd.xlane.f32.xlu1 %v416_v43  ;;  %v3910_v43 = vunpack.c.h.bf16 %v2683_v10 }
  0x2c   :  { %408 = vadd.xlane.f32.xlu0 %v407_v44  ;;  %v419_v44 = vsel %vm118_vm0, %v363_v27, 0.0  ;;  %v364_v27 = vmul.f32 %v3920_v40, %v2454_v1 }
  0x2e   :  { %v422_v55 = vsel %vm118_vm0, %v364_v27, 0.0 }
  0x2f   :  { %441 = vadd.xlane.f32.xlu1 %v440_v13  ;;  %v3907_v13 = vunpack.c.h.bf16 %v2703_v26 }
  0x30   :  { %432 = vadd.xlane.f32.xlu0 %v431_v15  ;;  %v3917_v15 = vunpack.c.l.bf16 %v2719_v41 }
  0x33   :  { %465 = vadd.xlane.f32.xlu1 %v464_v30  ;;  %v356_v30 = vmul.f32 %v3910_v43, %v2454_v1 }
  0x34   :  { %456 = vadd.xlane.f32.xlu0 %v455_v31  ;;  %v2747_v31 = vld [vmem:[%s3894_s1 + $0x78] sm:$0xff]  }
  0x35   :  { %3980 = vst [vmem:[#allocation10_spill] sm:$0xff] %v2747_v31  ;;  %v3918_v36 = vunpack.c.l.bf16 %v2747_v31  ;;  %v398_v29 = vsel %vm118_vm0, %v356_v30, 0.0 }
  0x37   :  { %420 = vadd.xlane.f32.xlu1 %v419_v44  ;;  %v443_v44 = vsel %vm118_vm0, %v371_v11, 0.0  ;;  %v3919_v11 = vunpack.c.l.bf16 %v2759_v37 }
  0x39   :  { %v373_v50 = vmul.f32 %v3919_v11, %v2454_v1 }
  0x3b   :  { %v449_v18 = vsel %vm118_vm0, %v373_v50, 0.0 }
  0x90   :  { %v127_v59 = vpop.xlane.xlu1 %126 }
  0x91   :  { %v121_v62 = vpop.xlane.xlu0 %120  ;;  %2152 = vtanh.f32 %v127_v59  ;;  %v3903_v59 = vunpack.c.h.bf16 %v2698_v21 }
  0x92   :  { %2154 = vtanh.f32 %v121_v62  ;;  %v395_v62 = vsel %vm118_vm0, %v355_v32, 0.0 }
  0x93   :  { %396 = vadd.xlane.f32.xlu0 %v395_v62  ;;  %v365_v62 = vmul.f32 %v3917_v15, %v2454_v1 }
  0x94   :  { %v130_v23 = vpop.xlane.xlu1 %129 }
  0x95   :  { %v124_v25 = vpop.xlane.xlu0 %123  ;;  %2156 = vtanh.f32 %v130_v23  ;;  %v425_v24 = vsel %vm118_vm0, %v365_v62, 0.0 }
  0x96   :  { %2158 = vtanh.f32 %v124_v25 }
  0x97   :  { %444 = vadd.xlane.f32.xlu0 %v443_v44  ;;  %v3930_v44 = vunpack.c.h.bf16 %v2747_v31 }
  0x98   :  { %v136_v38 = vpop.xlane.xlu1 %135 }
  0x99   :  { %v133_v39 = vpop.xlane.xlu0 %132  ;;  %2160 = vtanh.f32 %v136_v38  ;;  %v467_v38 = vsel %vm118_vm0, %v379_v45, 0.0  ;;  %v372_v45 = vmul.f32 %v3907_v13, %v2454_v1 }
  0x9a   :  { %2162 = vtanh.f32 %v133_v39  ;;  %v380_v39 = vmul.f32 %v3903_v59, %v2454_v1  ;;  %468 = vadd.xlane.f32.xlu1 %v467_v38 }
  0x9b   :  { %v446_v20 = vsel %vm118_vm0, %v372_v45, 0.0  ;;  %v366_v45 = vmul.f32 %v3921_v42, %v2454_v1  ;;  %399 = vadd.xlane.f32.xlu0 %v398_v29  ;;  %v3933_v42 = vunpack.c.h.bf16 %v2759_v37 }
  0x9c   :  { %v142_v23 = vpop.xlane.xlu1 %141  ;;  %v470_v51 = vsel %vm118_vm0, %v380_v39, 0.0  ;;  %v381_v39 = vmul.f32 %v3918_v36, %v2454_v1 }
  0x9d   :  { %v139_v25 = vpop.xlane.xlu0 %138  ;;  %2164 = vtanh.f32 %v142_v23  ;;  %v3913_v23 = vunpack.c.l.bf16 %v2736_v19 }
  0x9e   :  { %v2749_v32 = vpop.eup %2152  ;;  %2166 = vtanh.f32 %v139_v25  ;;  %423 = vadd.xlane.f32.xlu1 %v422_v55  ;;  %v473_v55 = vsel %vm118_vm0, %v381_v39, 0.0 }
  0x9f   :  { %v2761_v35 = vpop.eup %2154  ;;  %v163_v22 = vrot.slane %v2749_v32, 4  ;;  %v357_v27 = vmul.f32 %v3913_v23, %v2454_v1  ;;  %447 = vadd.xlane.f32.xlu0 %v446_v20 }
  0xa0   :  { %v151_v25 = vrot.slane %v2761_v35, 4 }
  0xa1   :  { %v164_v59 = vmax.f32 %v2749_v32, %v163_v22  ;;  %v3923_v22 = vunpack.c.h.bf16 %v2736_v19  ;;  %v401_v36 = vsel %vm118_vm0, %v357_v27, 0.0 }
  0xa2   :  { %v2778_v16 = vpop.eup %2156  ;;  %v152_v13 = vmax.f32 %v2761_v35, %v151_v25  ;;  %471 = vadd.xlane.f32.xlu1 %v470_v51 }
  0xa3   :  { %v2786_v57 = vpop.eup %2158  ;;  %v165_v30 = vrot.slane %v164_v59, 2  ;;  %v169_v43 = vrot.slane %v2778_v16, 4  ;;  %402 = vadd.xlane.f32.xlu0 %v401_v36 }
  0xa4   :  { %v153_v25 = vrot.slane %v152_v13, 2  ;;  %v157_v38 = vrot.slane %v2786_v57, 4 }
  0xa5   :  { %v166_v23 = vmax.f32 %v164_v59, %v165_v30  ;;  %v170_v60 = vmax.f32 %v2778_v16, %v169_v43  ;;  %v358_v43 = vmul.f32 %v3923_v22, %v2454_v1  ;;  %v382_v22 = vmul.f32 %v3930_v44, %v2454_v1 }
  0xa6   :  { %v2803_v62 = vpop.eup %2160  ;;  %v154_v28 = vmax.f32 %v152_v13, %v153_v25  ;;  %v158_v15 = vmax.f32 %v2786_v57, %v157_v38  ;;  %426 = vadd.xlane.f32.xlu1 %v425_v24 }
  0xa7   :  { %v2810_v59 = vpop.eup %2162  ;;  %v167_v30 = vrot.slane %v166_v23, 1  ;;  %v171_v11 = vrot.slane %v170_v60, 2  ;;  %v181_v40 = vrot.slane %v2803_v62, 4  ;;  %450 = vadd.xlane.f32.xlu0 %v449_v18  ;;  %v404_v24 = vsel %vm118_vm0, %v358_v43, 0.0 }
  0xa8   :  { %v155_v12 = vrot.slane %v154_v28, 1  ;;  %v159_v13 = vrot.slane %v158_v15, 2  ;;  %v175_v25 = vrot.slane %v2810_v59, 4 }
  0xa9   :  { %v168_v29 = vmax.f32 %v166_v23, %v167_v30  ;;  %v172_v27 = vmax.f32 %v170_v60, %v171_v11  ;;  %v182_v38 = vmax.f32 %v2803_v62, %v181_v40 }
  0xaa   :  { %v2820_v33 = vpop.eup %2164  ;;  %v156_v56 = vmax.f32 %v154_v28, %v155_v12  ;;  %v160_v49 = vmax.f32 %v158_v15, %v159_v13  ;;  %v176_v34 = vmax.f32 %v2810_v59, %v175_v25  ;;  %474 = vadd.xlane.f32.xlu1 %v473_v55 }
  0xab   :  { %v2167_v17 = vpop.eup %2166  ;;  %v201_v23 = vsub.f32 %v2749_v32, %v168_v29  ;;  %v173_v60 = vrot.slane %v172_v27, 1  ;;  %v183_v11 = vrot.slane %v182_v38, 2  ;;  %v193_v40 = vrot.slane %v2820_v33, 4  ;;  %405 = vadd.xlane.f32.xlu0 %v404_v24 }
  0xac   :  { %v199_v39 = vsub.f32 %v2761_v35, %v156_v56  ;;  %v161_v30 = vrot.slane %v160_v49, 1  ;;  %v177_v44 = vrot.slane %v176_v34, 2  ;;  %v187_v9 = vrot.slane %v2167_v17, 4 }
  0xad   :  { %v211_v28 = vmul.f32 1.442695, %v201_v23  ;;  %v174_v12 = vmax.f32 %v172_v27, %v173_v60  ;;  %v184_v15 = vmax.f32 %v182_v38, %v183_v11  ;;  %v194_v51 = vmax.f32 %v2820_v33, %v193_v40 }
  0xae   :  { %v207_v20 = vmul.f32 1.442695, %v199_v39  ;;  %v162_v13 = vmax.f32 %v160_v49, %v161_v30  ;;  %v178_v50 = vmax.f32 %v176_v34, %v177_v44  ;;  %v188_v25 = vmax.f32 %v2167_v17, %v187_v9 }
  0xaf   :  { %2168 = vpow2.f32 %v211_v28  ;;  %v202_v32 = vsub.f32 %v2778_v16, %v174_v12  ;;  %v185_v29 = vrot.slane %v184_v15, 1  ;;  %v195_v8 = vrot.slane %v194_v51, 2 }
  0xb0   :  { %2170 = vpow2.f32 %v207_v20  ;;  %v200_v56 = vsub.f32 %v2786_v57, %v162_v13  ;;  %v179_v35 = vrot.slane %v178_v50, 1  ;;  %v189_v23 = vrot.slane %v188_v25, 2 }
  0xb1   :  { %v213_v27 = vmul.f32 1.442695, %v202_v32  ;;  %v186_v38 = vmax.f32 %v184_v15, %v185_v29  ;;  %v196_v60 = vmax.f32 %v194_v51, %v195_v8  ;;  %v428_v11 = vsel %vm118_vm0, %v366_v45, 0.0 }
  0xb2   :  { %v209_v49 = vmul.f32 1.442695, %v200_v56  ;;  %v180_v34 = vmax.f32 %v178_v50, %v179_v35  ;;  %v190_v9 = vmax.f32 %v188_v25, %v189_v23  ;;  %v374_v57 = vmul.f32 %v3933_v42, %v2454_v1  ;;  %429 = vadd.xlane.f32.xlu1 %v428_v11 }
  0xb3   :  { %2172 = vpow2.f32 %v213_v27  ;;  %v204_v16 = vsub.f32 %v2803_v62, %v186_v38  ;;  %v197_v36 = vrot.slane %v196_v60, 1  ;;  %v476_v62 = vsel %vm118_vm0, %v382_v22, 0.0 }
  0xb4   :  { %2174 = vpow2.f32 %v209_v49  ;;  %v203_v8 = vsub.f32 %v2810_v59, %v180_v34  ;;  %v191_v44 = vrot.slane %v190_v9, 1  ;;  %v452_v43 = vsel %vm118_vm0, %v374_v57, 0.0 }
  0xb5   :  { %v217_v45 = vmul.f32 1.442695, %v204_v16  ;;  %v198_v40 = vmax.f32 %v196_v60, %v197_v36  ;;  %453 = vadd.xlane.f32.xlu0 %v452_v43 }
  0xb6   :  { %v215_v39 = vmul.f32 1.442695, %v203_v8  ;;  %v192_v30 = vmax.f32 %v190_v9, %v191_v44  ;;  %477 = vadd.xlane.f32.xlu1 %v476_v62 }
  0xb7   :  { %2176 = vpow2.f32 %v217_v45  ;;  %v206_v18 = vsub.f32 %v2820_v33, %v198_v40 }
  0xb8   :  { %2178 = vpow2.f32 %v215_v39  ;;  %v205_v55 = vsub.f32 %v2167_v17, %v192_v30 }
  0xb9   :  { %v221_v1 = vmul.f32 1.442695, %v206_v18 }
  0xba   :  { %v219_v28 = vmul.f32 1.442695, %v205_v55 }
  0xbb   :  { %2180 = vpow2.f32 %v221_v1 }
  0xbc   :  { %v2840_v59 = vpop.eup %2168  ;;  %2182 = vpow2.f32 %v219_v28 }
  0xbd   :  { %v2842_v12 = vpop.eup %2170  ;;  %v235_v15 = vrot.slane %v2840_v59, 4 }
  0xbe   :  { %v223_v33 = vrot.slane %v2842_v12, 4 }
  0xbf   :  { %v236_v22 = vadd.f32 %v2840_v59, %v235_v15 }
  0xc0   :  { %v2847_v51 = vpop.eup %2172  ;;  %v224_v17 = vadd.f32 %v2842_v12, %v223_v33 }
  0xc1   :  { %v2850_v20 = vpop.eup %2174  ;;  %v237_v13 = vrot.slane %v236_v22, 2  ;;  %v241_v50 = vrot.slane %v2847_v51, 4 }
  0xc2   :  { %v225_v25 = vrot.slane %v224_v17, 2  ;;  %v229_v32 = vrot.slane %v2850_v20, 4 }
  0xc3   :  { %v238_v29 = vadd.f32 %v237_v13, %v236_v22  ;;  %v242_v56 = vadd.f32 %v2847_v51, %v241_v50 }
  0xc4   :  { %v2855_v35 = vpop.eup %2176  ;;  %v226_v23 = vadd.f32 %v225_v25, %v224_v17  ;;  %v230_v27 = vadd.f32 %v2850_v20, %v229_v32 }
  0xc5   :  { %v2858_v38 = vpop.eup %2178  ;;  %v239_v60 = vrot.slane %v238_v29, 1  ;;  %v243_v11 = vrot.slane %v242_v56, 2  ;;  %v253_v49 = vrot.slane %v2855_v35, 4 }
  0xc6   :  { %v227_v34 = vrot.slane %v226_v23, 1  ;;  %v231_v9 = vrot.slane %v230_v27, 2  ;;  %v247_v24 = vrot.slane %v2858_v38, 4 }
  0xc7   :  { %v240_v16 = vadd.f32 %v239_v60, %v238_v29  ;;  %v244_v36 = vadd.f32 %v243_v11, %v242_v56  ;;  %v254_v57 = vadd.f32 %v2855_v35, %v253_v49 }
  0xc8   :  { %v2863_v8 = vpop.eup %2180  ;;  %v228_v44 = vadd.f32 %v227_v34, %v226_v23  ;;  %v232_v45 = vadd.f32 %v231_v9, %v230_v27  ;;  %v248_v40 = vadd.f32 %v2858_v38, %v247_v24 }
  0xc9   :  { %v2866_v39 = vpop.eup %2182  ;;  %v245_v30 = vrot.slane %v244_v36, 1  ;;  %v255_v18 = vrot.slane %v254_v57, 2  ;;  %v265_v62 = vrot.slane %v2863_v8, 4  ;;  %2184 = vrcp.f32 %v240_v16 }
  0xca   :  { %v233_v43 = vrot.slane %v232_v45, 1  ;;  %v249_v55 = vrot.slane %v248_v40, 2  ;;  %v259_v1 = vrot.slane %v2866_v39, 4  ;;  %2186 = vrcp.f32 %v228_v44 }
  0xcb   :  { %v246_v28 = vadd.f32 %v245_v30, %v244_v36  ;;  %v256_v15 = vadd.f32 %v255_v18, %v254_v57  ;;  %v266_v33 = vadd.f32 %v2863_v8, %v265_v62 }
  0xcc   :  { %v234_v22 = vadd.f32 %v233_v43, %v232_v45  ;;  %v250_v17 = vadd.f32 %v249_v55, %v248_v40  ;;  %v260_v13 = vadd.f32 %v2866_v39, %v259_v1 }
  0xcd   :  { %v257_v50 = vrot.slane %v256_v15, 1  ;;  %v267_v25 = vrot.slane %v266_v33, 2  ;;  %2188 = vrcp.f32 %v246_v28 }
  0xce   :  { %v251_v32 = vrot.slane %v250_v17, 1  ;;  %v261_v29 = vrot.slane %v260_v13, 2  ;;  %2190 = vrcp.f32 %v234_v22 }
  0xcf   :  { %v258_v56 = vadd.f32 %v257_v50, %v256_v15  ;;  %v268_v23 = vadd.f32 %v267_v25, %v266_v33 }
  0xd0   :  { %v252_v27 = vadd.f32 %v251_v32, %v250_v17  ;;  %v262_v60 = vadd.f32 %v261_v29, %v260_v13 }
  0xd1   :  { %v269_v11 = vrot.slane %v268_v23, 1  ;;  %2192 = vrcp.f32 %v258_v56 }
  0xd2   :  { %v263_v49 = vrot.slane %v262_v60, 1  ;;  %2194 = vrcp.f32 %v252_v27 }
  0xd3   :  { %v270_v34 = vadd.f32 %v269_v11, %v268_v23 }
  0xd4   :  { %v264_v9 = vadd.f32 %v263_v49, %v262_v60 }
  0xd5   :  { %2196 = vrcp.f32 %v270_v34 }
  0xd6   :  { %v2185_v24 = vpop.eup %2184  ;;  %2198 = vrcp.f32 %v264_v9 }
  0xd7   :  { %v2187_v16 = vpop.eup %2186  ;;  %v281_v36 = vmul.f32 %v2185_v24, %v2840_v59  ;;  %v3984_v24 = vunpack.c.h.bf16 %v2487_v14 }
  0xd8   :  { %v279_v57 = vmul.f32 %v2187_v16, %v2842_v12 }
  0xd9   :  { %v289_v44 = vmul.f32 %v1989_v3, %v281_v36 }
  0xda   :  { %v2189_v45 = vpop.eup %2188  ;;  %v287_v40 = vmul.f32 %v1985_v4, %v279_v57  ;;  %v3985_v57 = vunpack.c.l.bf16 %v2487_v14 }
  0xdb   :  { %v2191_v30 = vpop.eup %2190  ;;  %v282_v18 = vmul.f32 %v2189_v45, %v2847_v51  ;;  %v309_v62 = vsel %vm118_vm0, %v289_v44, 0.0 }
  0xdc   :  { %v280_v43 = vmul.f32 %v2191_v30, %v2850_v20  ;;  %v295_v55 = vsel %vm118_vm0, %v287_v40, 0.0  ;;  %v310_v1 = vrot.slane %v309_v62, 4 }
  0xdd   :  { %v290_v59 = vmul.f32 %v1990_v5, %v282_v18  ;;  %v296_v12 = vrot.slane %v295_v55, 4 }
  0xde   :  { %v2193_v28 = vpop.eup %2192  ;;  %v288_v3 = vmul.f32 %v1986_v6, %v280_v43  ;;  %v311_v15 = vadd.f32 %v310_v1, %v309_v62  ;;  %v3983_v6 = vunpack.c.l.bf16 %v2468_v7 }
  0xdf   :  { %v2195_v4 = vpop.eup %2194  ;;  %v284_v33 = vmul.f32 %v2193_v28, %v2855_v35  ;;  %v297_v51 = vadd.f32 %v296_v12, %v295_v55  ;;  %v316_v22 = vsel %vm118_vm0, %v290_v59, 0.0 }
  0xe0   :  { %v283_v20 = vmul.f32 %v2195_v4, %v2858_v38  ;;  %v302_v17 = vsel %vm118_vm0, %v288_v3, 0.0  ;;  %v312_v13 = vrot.slane %v311_v15, 2  ;;  %v317_v50 = vrot.slane %v316_v22, 4 }
  0xe1   :  { %v292_v5 = vmul.f32 %v3982_v0, %v284_v33  ;;  %v298_v25 = vrot.slane %v297_v51, 2  ;;  %v303_v32 = vrot.slane %v302_v17, 4 }
  0xe2   :  { %v2197_v2 = vpop.eup %2196  ;;  %v291_v29 = vmul.f32 %v3983_v6, %v283_v20  ;;  %v318_v56 = vadd.f32 %v317_v50, %v316_v22  ;;  %v313_v49 = vadd.f32 %v312_v13, %v311_v15 }
  0xe3   :  { %v2199_v35 = vpop.eup %2198  ;;  %v286_v23 = vmul.f32 %v2197_v2, %v2863_v8  ;;  %v299_v27 = vadd.f32 %v298_v25, %v297_v51  ;;  %v304_v60 = vadd.f32 %v303_v32, %v302_v17  ;;  %v330_v38 = vsel %vm118_vm0, %v292_v5, 0.0 }
  0xe4   :  { %v285_v11 = vmul.f32 %v2199_v35, %v2866_v39  ;;  %v319_v34 = vrot.slane %v318_v56, 2  ;;  %v323_v9 = vsel %vm118_vm0, %v291_v29, 0.0  ;;  %v331_v8 = vrot.slane %v330_v38, 4 }
  0xe5   :  { %v294_v16 = vmul.f32 %v3984_v24, %v286_v23  ;;  %v305_v36 = vrot.slane %v304_v60, 2  ;;  %v324_v7 = vrot.slane %v323_v9, 4  ;;  %v300_v40 = vrot.slane %v299_v27, 1  ;;  %v1534_v24 = vld [vmem:[%s3895_s5 + $0x78] sm:$0xff] }
  0xe6   :  { %v293_v44 = vmul.f32 %v3985_v57, %v285_v11  ;;  %v320_v45 = vadd.f32 %v319_v34, %v318_v56  ;;  %v314_v39 = vrot.slane %v313_v49, 1  ;;  %v332_v43 = vadd.f32 %v331_v8, %v330_v38  ;;  %v1581_v57 = vld [vmem:[%s3895_s5 + $0x1f0] sm:$0xff]  ;;  %v1548_v8 = vld [vmem:[%s3895_s5 + $0xe8] sm:$0xff] }
  0xe7   :  { %v306_v30 = vadd.f32 %v305_v36, %v304_v60  ;;  %v325_v18 = vadd.f32 %v324_v7, %v323_v9  ;;  %v344_v62 = vsel %vm118_vm0, %v294_v16, 0.0  ;;  %v301_v14 = vadd.f32 %v300_v40, %v299_v27  ;;  %v1566_v16 = vld [vmem:[%s3895_s5 + $0x178] sm:$0xff]  ;;  %v1549_v7 = vld [vmem:[%s3895_s5 + $0xf0] sm:$0xff]  ;;  %v1580_v40 = vld [vmem:[%s3895_s5 + $0x1e8] sm:$0xff] }
  0xe8   :  { %v337_v55 = vsel %vm118_vm0, %v293_v44, 0.0  ;;  %v345_v1 = vrot.slane %v344_v62, 4  ;;  %v321_v12 = vrot.slane %v320_v45, 1  ;;  %v333_v15 = vrot.slane %v332_v43, 2  ;;  %v1533_v44 = vld [vmem:[%s3895_s5 + $0x70] sm:$0xff] }
  0xe9   :  { %v307_v59 = vrot.slane %v306_v30, 1  ;;  %v326_v28 = vrot.slane %v325_v18, 2  ;;  %v338_v3 = vrot.slane %v337_v55, 4  ;;  %v315_v20 = vadd.f32 %v314_v39, %v313_v49  ;;  %v1579_v39 = vld [vmem:[%s3895_s5 + $0x1e0] sm:$0xff] }
  0xea   :  { %v346_v4 = vadd.f32 %v345_v1, %v344_v62  ;;  %v334_v17 = vadd.f32 %v333_v15, %v332_v43  ;;  %v322_v50 = vadd.f32 %v321_v12, %v320_v45  ;;  %v1565_v45 = vld [vmem:[%s3895_s5 + $0x170] sm:$0xff]  ;;  %v1547_v62 = vld [vmem:[%s3895_s5 + $0xe0] sm:$0xff]  ;;  %v1546_v1 = vld [vmem:[%s3895_s5 + $0xd8] sm:$0xff] }
  0xeb   :  { %v308_v33 = vadd.f32 %v307_v59, %v306_v30  ;;  %v327_v51 = vadd.f32 %v326_v28, %v325_v18  ;;  %v339_v22 = vadd.f32 %v338_v3, %v337_v55  ;;  %v1532_v30 = vld [vmem:[%s3895_s5 + $0x68] sm:$0xff]  ;;  %v1531_v43 = vld [vmem:[%s3895_s5 + $0x60] sm:$0xff]  ;;  %v1578_v59 = vld [vmem:[%s3895_s5 + $0x1d8] sm:$0xff] }
  0xec   :  { %v347_v13 = vrot.slane %v346_v4, 2  ;;  %v335_v32 = vrot.slane %v334_v17, 1  ;;  %v1564_v18 = vld [vmem:[%s3895_s5 + $0x168] sm:$0xff]  ;;  %v1563_v55 = vld [vmem:[%s3895_s5 + $0x160] sm:$0xff]  ;;  %v1530_v12 = vld [vmem:[%s3895_s5 + $0x58] sm:$0xff] }
  0xed   :  { %v328_v0 = vrot.slane %v327_v51, 1  ;;  %v340_v5 = vrot.slane %v339_v22, 2  ;;  %v1358_v25 = vsel %vm1357_vm1, %v308_v33, %v301_v14  ;;  %v1562_v28 = vld [vmem:[%s3895_s5 + $0x158] sm:$0xff]  ;;  %v1545_v3 = vld [vmem:[%s3895_s5 + $0xd0] sm:$0xff]  ;;  %v1544_v33 = vld [vmem:[%s3895_s5 + $0xc8] sm:$0xff] }
  0xee   :  { %v348_v2 = vadd.f32 %v347_v13, %v346_v4  ;;  %v1360_v6 = vsel %vm1359_vm2, %v315_v20, %v1358_v25  ;;  %v336_v23 = vadd.f32 %v335_v32, %v334_v17  ;;  %v1577_v15 = vld [vmem:[%s3895_s5 + $0x1d0] sm:$0xff]  ;;  %v1560_v20 = vld [vmem:[%s3895_s5 + $0x148] sm:$0xff]  ;;  %v1543_v17 = vld [vmem:[%s3895_s5 + $0xc0] sm:$0xff] }
  0xef   :  { %v329_v29 = vadd.f32 %v328_v0, %v327_v51  ;;  %v341_v56 = vadd.f32 %v340_v5, %v339_v22  ;;  %v1362_v35 = vsel %vm1361_vm3, %v322_v50, %v1360_v6  ;;  %v1529_v4 = vld [vmem:[%s3895_s5 + $0x50] sm:$0xff]  ;;  %v1576_v51 = vld [vmem:[%s3895_s5 + $0x1c8] sm:$0xff]  ;;  %v1575_v13 = vld [vmem:[%s3895_s5 + $0x1c0] sm:$0xff] }
  0xf0   :  { %v349_v27 = vrot.slane %v348_v2, 1  ;;  %v1561_v14 = vld [vmem:[%s3895_s5 + $0x150] sm:$0xff]  ;;  %v1528_v22 = vld [vmem:[%s3895_s5 + $0x48] sm:$0xff]  ;;  %v1527_v50 = vld [vmem:[%s3895_s5 + $0x40] sm:$0xff] }
  0xf1   :  { %v342_v60 = vrot.slane %v341_v56, 1  ;;  %v1364_v38 = vsel %vm1363_vm4, %v329_v29, %v1362_v35  ;;  %v1559_v0 = vld [vmem:[%s3895_s5 + $0x140] sm:$0xff]  ;;  %v1542_v5 = vld [vmem:[%s3895_s5 + $0xb8] sm:$0xff]  ;;  %v1541_v6 = vld [vmem:[%s3895_s5 + $0xb0] sm:$0xff] }
  0xf2   :  { %v350_v11 = vadd.f32 %v349_v27, %v348_v2  ;;  %v1366_v34 = vsel %vm1365_vm5, %v336_v23, %v1364_v38  ;;  %v1574_v25 = vld [vmem:[%s3895_s5 + $0x1b8] sm:$0xff]  ;;  %v1573_v29 = vld [vmem:[%s3895_s5 + $0x1b0] sm:$0xff]  ;;  %v1540_v23 = vld [vmem:[%s3895_s5 + $0xa8] sm:$0xff] }
  0xf3   :  { %v343_v49 = vadd.f32 %v342_v60, %v341_v56  ;;  %v1526_v32 = vld [vmem:[%s3895_s5 + $0x38] sm:$0xff]  ;;  %v1525_v56 = vld [vmem:[%s3895_s5 + $0x30] sm:$0xff]  ;;  %v1572_v27 = vld [vmem:[%s3895_s5 + $0x1a8] sm:$0xff] }
  0xf4   :  { %v1558_v2 = vld [vmem:[%s3895_s5 + $0x138] sm:$0xff]  ;;  %v1557_v35 = vld [vmem:[%s3895_s5 + $0x130] sm:$0xff]  ;;  %v1524_v60 = vld [vmem:[%s3895_s5 + $0x28] sm:$0xff] }
  0xf5   :  { %v1368_v9 = vsel %vm1367_vm6, %v343_v49, %v1366_v34  ;;  %v1556_v38 = vld [vmem:[%s3895_s5 + $0x128] sm:$0xff]  ;;  %v1571_v49 = vld [vmem:[%s3895_s5 + $0x1a0] sm:$0xff] }
  0xf6   :  { %v2917_v36 = vsel %vm1369_vm7, %v350_v11, %v1368_v9  ;;  %v1539_v11 = vld [vmem:[%s3895_s5 + $0xa0] sm:$0xff] }
  0xf7   :  { %3986 = vst [vmem:[#allocation12_spill] sm:$0xff] %v2917_v36  ;;  %1981 = vmatmul.mubr.msk.f32.vlgmr.msra.gmra.mxu0 %vm118_vm0, %v2917_v36  ;;  %1982 = vmatmul.mubr.msk.f32.vlgmr.msra.gmra.mxu1 %vm118_vm0, %v2917_v36  ;;  %v1523_v34 = vld [vmem:[%s3895_s5 + $0x20] sm:$0xff] }
  0xf8   :  { %2082 = vmatpush3.msra.mxu0 %v1534_v24  ;;  %2117 = vmatpush3.msra.mxu1 %v1566_v16  ;;  %v1555_v9 = vld [vmem:[%s3895_s5 + $0x120] sm:$0xff]  ;;  %v1538_v24 = vld [vmem:[%s3895_s5 + $0x98] sm:$0xff] }
  0xf9   :  { %2083 = vmatprep.subr.mxu0 %v1549_v7  ;;  %2118 = vmatprep.subr.mxu1 %v1581_v57  ;;  %v1570_v16 = vld [vmem:[%s3895_s5 + $0x198] sm:$0xff] }
  0xfa   :  { %2084 = vmatpush3.msra.mxu0 %v1533_v44  ;;  %2119 = vmatpush3.msra.mxu1 %v1565_v45  ;;  %v1522_v7 = vld [vmem:[%s3895_s5 + $0x18] sm:$0xff]  ;;  %v1537_v44 = vld [vmem:[%s3895_s5 + $0x90] sm:$0xff] }
  0xfb   :  { %2085 = vmatprep.subr.mxu0 %v1548_v8  ;;  %2120 = vmatprep.subr.mxu1 %v1580_v40  ;;  %v1554_v57 = vld [vmem:[%s3895_s5 + $0x118] sm:$0xff]  ;;  %v1569_v45 = vld [vmem:[%s3895_s5 + $0x190] sm:$0xff] }
  0xfc   :  { %2086 = vmatpush3.msra.mxu0 %v1532_v30  ;;  %2121 = vmatpush3.msra.mxu1 %v1564_v18  ;;  %v1521_v8 = vld [vmem:[%s3895_s5 + $0x10] sm:$0xff]  ;;  %v1536_v30 = vld [vmem:[%s3895_s5 + $0x88] sm:$0xff] }
  0xfd   :  { %2087 = vmatprep.subr.mxu0 %v1547_v62  ;;  %2122 = vmatprep.subr.mxu1 %v1579_v39  ;;  %v1553_v40 = vld [vmem:[%s3895_s5 + $0x110] sm:$0xff]  ;;  %v1568_v18 = vld [vmem:[%s3895_s5 + $0x188] sm:$0xff] }
  0xfe   :  { %2088 = vmatpush3.msra.mxu0 %v1531_v43  ;;  %2123 = vmatpush3.msra.mxu1 %v1563_v55  ;;  %v1520_v62 = vld [vmem:[%s3895_s5 + $0x8] sm:$0xff]  ;;  %v1535_v43 = vld [vmem:[%s3895_s5 + $0x80] sm:$0xff] }
  0xff   :  { %2089 = vmatprep.subr.mxu0 %v1546_v1  ;;  %2124 = vmatprep.subr.mxu1 %v1578_v59  ;;  %v1552_v39 = vld [vmem:[%s3895_s5 + $0x108] sm:$0xff]  ;;  %v1567_v55 = vld [vmem:[%s3895_s5 + $0x180] sm:$0xff] }
 0x100   :  { %2090 = vmatpush3.msra.mxu0 %v1530_v12  ;;  %2125 = vmatpush3.msra.mxu1 %v1562_v28  ;;  %v1519_v1 = vld [vmem:[%s3895_s5] sm:$0xff]  ;;  %v412_v12 = vpop.xlane.xlu1 %411 }
 0x101   :  { %2091 = vmatprep.subr.mxu0 %v1545_v3  ;;  %2126 = vmatprep.subr.mxu1 %v1577_v15  ;;  %v1551_v59 = vld [vmem:[%s3895_s5 + $0x100] sm:$0xff]  ;;  %2200 = vtanh.f32 %v412_v12 }
 0x102   :  { %2092 = vmatpush3.msra.mxu0 %v1529_v4  ;;  %2127 = vmatpush3.msra.mxu1 %v1561_v14  ;;  %v388_v4 = vpop.xlane.xlu0 %387 }
 0x103   :  { %2093 = vmatprep.subr.mxu0 %v1544_v33  ;;  %2128 = vmatprep.subr.mxu1 %v1576_v51  ;;  %2202 = vtanh.f32 %v388_v4 }
 0x104   :  { %2094 = vmatpush3.msra.mxu0 %v1528_v22  ;;  %2129 = vmatpush3.msra.mxu1 %v1560_v20  ;;  %v460_v28 = vpop.xlane.xlu1 %459 }
 0x105   :  { %2095 = vmatprep.subr.mxu0 %v1543_v17  ;;  %2130 = vmatprep.subr.mxu1 %v1575_v13  ;;  %2204 = vtanh.f32 %v460_v28 }
 0x106   :  { %2096 = vmatpush3.msra.mxu0 %v1527_v50  ;;  %2131 = vmatpush3.msra.mxu1 %v1559_v0  ;;  %v436_v33 = vpop.xlane.xlu0 %435 }
 0x107   :  { %2097 = vmatprep.subr.mxu0 %v1542_v5  ;;  %2132 = vmatprep.subr.mxu1 %v1574_v25  ;;  %v1329_v5 = vlaneseq  ;;  %2206 = vtanh.f32 %v436_v33 }
 0x108   :  { %2098 = vmatpush3.msra.mxu0 %v1526_v32  ;;  %2133 = vmatpush3.msra.mxu1 %v1558_v2  ;;  %v415_v3 = vpop.xlane.xlu1 %414 }
 0x109   :  { %2099 = vmatprep.subr.mxu0 %v1541_v6  ;;  %2134 = vmatprep.subr.mxu1 %v1573_v29  ;;  %v1330_v25 = vshrl.u32 %v1329_v5, 7  ;;  %2208 = vtanh.f32 %v415_v3 }
 0x10a   :  { %2100 = vmatpush3.msra.mxu0 %v1525_v56  ;;  %2135 = vmatpush3.msra.mxu1 %v1557_v35  ;;  %v391_v22 = vpop.xlane.xlu0 %390  ;;  %v1327_v56 = vld [vmem:[%s3896_s4] sm:$0xf] }
 0x10b   :  { %2101 = vmatprep.subr.mxu0 %v1540_v23  ;;  %2136 = vmatprep.subr.mxu1 %v1572_v27  ;;  %v1331_v6 = vsub.s32 0, %v1330_v25  ;;  %2210 = vtanh.f32 %v391_v22  ;;  %v1339_v35 = vsub.s32 2, %v1330_v25  ;;  %v1335_v23 = vsub.s32 1, %v1330_v25 }
 0x10c   :  { %2102 = vmatpush3.msra.mxu0 %v1524_v60  ;;  %2137 = vmatpush3.msra.mxu1 %v1556_v38  ;;  %v463_v15 = vpop.xlane.xlu1 %462  ;;  %v1343_v27 = vsub.s32 3, %v1330_v25 }
 0x10d   :  { %2103 = vmatprep.subr.mxu0 %v1539_v11  ;;  %2138 = vmatprep.subr.mxu1 %v1571_v49 }
 0x10e   :  { %2104 = vmatpush3.msra.mxu0 %v1523_v34  ;;  %2139 = vmatpush3.msra.mxu1 %v1555_v9  ;;  %v439_v17 = vpop.xlane.xlu0 %438  ;;  %v3115_v29 = vpop.eup %2200  ;;  %v1332_v34 = vrot.slane %v1327_v56, %v1331_v6 }
 0x10f   :  { %2105 = vmatprep.subr.mxu0 %v1538_v24  ;;  %2140 = vmatprep.subr.mxu1 %v1570_v16  ;;  %v565_v49 = vrot.slane %v3115_v29, 4  ;;  %v1340_v16 = vrot.slane %v1327_v56, %v1339_v35 }
 0x110   :  { %2106 = vmatpush3.msra.mxu0 %v1522_v7  ;;  %2141 = vmatpush3.msra.mxu1 %v1554_v57  ;;  %v3103_v14 = vpop.xlane.xlu1 %393  ;;  %v3124_v11 = vpop.eup %2202  ;;  %v1336_v7 = vrot.slane %v1327_v56, %v1335_v23  ;;  %v1344_v57 = vrot.slane %v1327_v56, %v1343_v27 }
 0x111   :  { %2107 = vmatprep.subr.mxu0 %v1537_v44  ;;  %2142 = vmatprep.subr.mxu1 %v1569_v45  ;;  %v517_v44 = vrot.slane %v3124_v11, 4 }
 0x112   :  { %2108 = vmatpush3.msra.mxu0 %v1521_v8  ;;  %2143 = vmatpush3.msra.mxu1 %v1553_v40  ;;  %v3109_v50 = vpop.xlane.xlu0 %384  ;;  %v3127_v9 = vpop.eup %2204  ;;  %v566_v40 = vmax.f32 %v3115_v29, %v565_v49 }
 0x113   :  { %2109 = vmatprep.subr.mxu0 %v1536_v30  ;;  %2144 = vmatprep.subr.mxu1 %v1568_v18  ;;  %v518_v3 = vmax.f32 %v3124_v11, %v517_v44 }
 0x114   :  { %2110 = vmatpush3.msra.mxu0 %v1520_v62  ;;  %2145 = vmatpush3.msra.mxu1 %v1552_v39  ;;  %v418_v51 = vpop.xlane.xlu1 %417  ;;  %v3129_v24 = vpop.eup %2206  ;;  %v661_v39 = vrot.slane %v3127_v9, 4  ;;  %v567_v4 = vrot.slane %v566_v40, 2 }
 0x115   :  { %2111 = vmatprep.subr.mxu0 %v1535_v43  ;;  %2146 = vmatprep.subr.mxu1 %v1567_v55  ;;  %v613_v43 = vrot.slane %v3129_v24, 4 }
 0x116   :  { %2112 = vmatpush3.msra.mxu0 %v1519_v1  ;;  %2147 = vmatpush3.msra.mxu1 %v1551_v59  ;;  %v409_v32 = vpop.xlane.xlu0 %408  ;;  %v662_v33 = vmax.f32 %v3127_v9, %v661_v39 }
 0x117   :  { %2212 = vtanh.f32 %v409_v32  ;;  %v614_v22 = vmax.f32 %v3129_v24, %v613_v43  ;;  %v519_v32 = vrot.slane %v518_v3, 2 }
 0x118   :  { %v3105_v20 = vpop.xlane.xlu1 %441  ;;  %2214 = vtanh.f32 %v463_v15  ;;  %v3140_v15 = vpop.eup %2208  ;;  %v663_v35 = vrot.slane %v662_v33, 2 }
 0x119   :  { %2216 = vtanh.f32 %v439_v17  ;;  %v3146_v25 = vpop.eup %2210  ;;  %v571_v6 = vrot.slane %v3140_v15, 4  ;;  %v615_v23 = vrot.slane %v614_v22, 2  ;;  %v520_v49 = vmax.f32 %v518_v3, %v519_v32 }
 0x11a   :  { %v3120_v60 = vpop.xlane.xlu0 %432  ;;  %2218 = vtanh.f32 %v418_v51  ;;  %v568_v51 = vmax.f32 %v566_v40, %v567_v4  ;;  %v523_v27 = vrot.slane %v3146_v25, 4 }
 0x11b   :  { %v616_v40 = vmax.f32 %v614_v22, %v615_v23  ;;  %v521_v39 = vrot.slane %v520_v49, 1 }
 0x11c   :  { %v3107_v13 = vpop.xlane.xlu1 %465 }
 0x11d   :  { %v522_v32 = vmax.f32 %v520_v49, %v521_v39 }
 0x11e   :  { %v3133_v18 = vpop.xlane.xlu0 %456 }
 0x120   :  { %v3111_v0 = vpop.xlane.xlu1 %420 }
 0x122   :  { %v3144_v17 = vpop.xlane.xlu0 %396 }
 0x124   :  { %v3113_v2 = vpop.xlane.xlu1 %468  ;;  %v3149_v56 = vpop.eup %2212 }
 0x128   :  { %v3122_v38 = vpop.xlane.xlu1 %423 }
 0x12c   :  { %v3135_v62 = vpop.xlane.xlu1 %471 }
 0x130   :  { %v427_v5 = vpop.xlane.xlu1 %426 }
 0x134   :  { %v3158_v44 = vpop.xlane.xlu1 %474 }
 0x1b7   :  { %v1439_v45 = vpop.f32.mrf.mxu0  ;;  %v1510_v8 = vpop.f32.mrf.mxu1 }
 0x1b8   :  { %v1440_v30 = vadd.f32 %v1439_v45, %v1332_v34  ;;  %v1511_v59 = vadd.f32 %v1510_v8, %v1340_v16  ;;  %v569_v34 = vrot.slane %v568_v51, 1  ;;  %v572_v16 = vmax.f32 %v3140_v15, %v571_v6  ;;  %v3160_v45 = vpop.eup %2214 }
 0x1b9   :  { %v1441_v55 = vpop.f32.mrf.mxu0  ;;  %v1512_v1 = vpop.f32.mrf.mxu1  ;;  %v664_v8 = vmax.f32 %v662_v33, %v663_v35 }
 0x1ba   :  { %v1442_v12 = vadd.f32 %v1441_v55, %v1336_v7  ;;  %v1513_v28 = vadd.f32 %v1512_v1, %v1344_v57  ;;  %2220 = vtanh.f32 %v1440_v30  ;;  %v559_v7 = vrot.slane %v3149_v56, 4  ;;  %v3156_v57 = vpop.xlane.xlu0 %444 }
 0x1bb   :  { %v570_v55 = vmax.f32 %v568_v51, %v569_v34  ;;  %v573_v1 = vrot.slane %v572_v16, 2 }
 0x1bc   :  { %2222 = vtanh.f32 %v1442_v12 }
 0x1bd   :  { %2224 = vtanh.f32 %v1513_v28  ;;  %v617_v28 = vrot.slane %v616_v40, 1  ;;  %v712_v6 = vsub.f32 %v3115_v29, %v570_v55 }
 0x1be   :  { %2226 = vtanh.f32 %v1511_v59  ;;  %v560_v59 = vmax.f32 %v3149_v56, %v559_v7  ;;  %v3172_v33 = vpop.xlane.xlu0 %399 }
 0x1bf   :  { %2228 = vtanh.f32 %v3103_v14  ;;  %v3163_v14 = vpop.eup %2216  ;;  %v753_v29 = vmul.f32 1.442695, %v712_v6 }
 0x1c0   :  { %2230 = vtanh.f32 %v3109_v50  ;;  %v524_v50 = vmax.f32 %v3146_v25, %v523_v27  ;;  %v3167_v30 = vpop.eup %2218  ;;  %v561_v35 = vrot.slane %v560_v59, 2  ;;  %v618_v27 = vmax.f32 %v616_v40, %v617_v28 }
 0x1c1   :  { %2232 = vtanh.f32 %v3111_v0  ;;  %v665_v0 = vrot.slane %v664_v8, 1  ;;  %v577_v51 = vrot.slane %v3167_v30, 4  ;;  %v619_v49 = vrot.slane %v3163_v14, 4 }
 0x1c2   :  { %2234 = vtanh.f32 %v3105_v20  ;;  %v525_v4 = vrot.slane %v524_v50, 2  ;;  %v430_v20 = vpop.xlane.xlu1 %429  ;;  %v3186_v40 = vpop.xlane.xlu0 %447 }
 0x1c3   :  { %2236 = vtanh.f32 %v3120_v60  ;;  %v667_v60 = vrot.slane %v3160_v45, 4  ;;  %v666_v23 = vmax.f32 %v664_v8, %v665_v0  ;;  %v562_v8 = vmax.f32 %v560_v59, %v561_v35 }
 0x1c4   :  { %2238 = vtanh.f32 %v3122_v38  ;;  %v574_v38 = vmax.f32 %v572_v16, %v573_v1  ;;  %v526_v7 = vmax.f32 %v524_v50, %v525_v4  ;;  %v704_v16 = vsub.f32 %v3124_v11, %v522_v32 }
 0x1c5   :  { %2240 = vtanh.f32 %v427_v5  ;;  %v728_v55 = vsub.f32 %v3127_v9, %v666_v23  ;;  %v720_v50 = vsub.f32 %v3129_v24, %v618_v27 }
 0x1c6   :  { %2242 = vtanh.f32 %v430_v20  ;;  %v575_v5 = vrot.slane %v574_v38, 1  ;;  %v527_v28 = vrot.slane %v526_v7, 1  ;;  %v737_v9 = vmul.f32 1.442695, %v704_v16  ;;  %v403_v42 = vpop.xlane.xlu0 %402 }
 0x1c7   :  { %v2221_v43 = vpop.eup %2220  ;;  %2244 = vtanh.f32 %v3107_v13 }
 0x1c8   :  { %2246 = vtanh.f32 %v3133_v18  ;;  %v576_v24 = vmax.f32 %v574_v38, %v575_v5  ;;  %v528_v23 = vmax.f32 %v526_v7, %v527_v28 }
 0x1c9   :  { %v2223_v12 = vpop.eup %2222  ;;  %2248 = vpow2.f32 %v753_v29 }
 0x1ca   :  { %v2225_v3 = vpop.eup %2224  ;;  %1647 = vmatprep.mubr.f32.mxu0 %v2223_v12  ;;  %v668_v12 = vmax.f32 %v3160_v45, %v667_v60  ;;  %v785_v60 = vmul.f32 1.442695, %v728_v55  ;;  %2250 = vtanh.f32 %v3144_v17  ;;  %v713_v16 = vsub.f32 %v3140_v15, %v576_v24 }
 0x1cb   :  { %v2227_v22 = vpop.eup %2226  ;;  %1717 = vmatprep.mubr.f32.mxu1 %v2225_v3  ;;  %1648 = vmatmul.mubr.f32.vlgmr.msra.gmra.mxu0 %v2221_v43  ;;  %v578_v43 = vmax.f32 %v3167_v30, %v577_v51  ;;  %v620_v3 = vmax.f32 %v3163_v14, %v619_v49  ;;  %v769_v51 = vmul.f32 1.442695, %v720_v50  ;;  %2252 = vpow2.f32 %v737_v9 }
 0x1cc   :  { %1718 = vmatmul.mubr.f32.vlgmr.msra.gmra.mxu1 %v2227_v22  ;;  %v3177_v34 = vpop.eup %2228  ;;  %v669_v59 = vrot.slane %v668_v12, 2  ;;  %v563_v22 = vrot.slane %v562_v8, 1  ;;  %2254 = vpow2.f32 %v785_v60  ;;  %v705_v17 = vsub.f32 %v3146_v25, %v528_v23 }
 0x1cd   :  { %v3180_v39 = vpop.eup %2230  ;;  %v529_v1 = vrot.slane %v3177_v34, 4  ;;  %v579_v4 = vrot.slane %v578_v43, 2  ;;  %v621_v18 = vrot.slane %v620_v3, 2  ;;  %2256 = vpow2.f32 %v769_v51  ;;  %v3223_v51 = vpop.xlane.xlu0 %450 }
 0x1ce   :  { %v3191_v0 = vpop.eup %2232  ;;  %v511_v13 = vrot.slane %v3180_v39, 4  ;;  %v670_v36 = vmax.f32 %v668_v12, %v669_v59  ;;  %v564_v5 = vmax.f32 %v562_v8, %v563_v22  ;;  %v755_v9 = vmul.f32 1.442695, %v713_v16 }
 0x1cf   :  { %v3196_v11 = vpop.eup %2234  ;;  %v530_v6 = vmax.f32 %v3177_v34, %v529_v1  ;;  %v583_v35 = vrot.slane %v3191_v0, 4  ;;  %v580_v29 = vmax.f32 %v578_v43, %v579_v4  ;;  %v622_v12 = vmax.f32 %v620_v3, %v621_v18 }
 0x1d0   :  { %v3198_v20 = vpop.eup %2236  ;;  %v512_v27 = vmax.f32 %v3180_v39, %v511_v13  ;;  %v625_v49 = vrot.slane %v3196_v11, 4  ;;  %v671_v59 = vrot.slane %v670_v36, 1  ;;  %v711_v24 = vsub.f32 %v3149_v56, %v564_v5 }
 0x1d1   :  { %v3200_v32 = vpop.eup %2238  ;;  %v607_v38 = vrot.slane %v3198_v20, 4  ;;  %v531_v7 = vrot.slane %v530_v6, 2  ;;  %v584_v1 = vmax.f32 %v3191_v0, %v583_v35  ;;  %v581_v15 = vrot.slane %v580_v29, 1 }
 0x1d2   :  { %v589_v55 = vrot.slane %v3200_v32, 4  ;;  %v3210_v50 = vpop.eup %2240  ;;  %v513_v43 = vrot.slane %v512_v27, 2  ;;  %v626_v13 = vmax.f32 %v3196_v11, %v625_v49  ;;  %2258 = vtanh.f32 %v3172_v33 }
 0x1d3   :  { %v3213_v28 = vpop.eup %2242  ;;  %v608_v8 = vmax.f32 %v3198_v20, %v607_v38  ;;  %v595_v60 = vrot.slane %v3210_v50, 4  ;;  %v532_v3 = vmax.f32 %v530_v6, %v531_v7  ;;  %v585_v35 = vrot.slane %v584_v1, 2 }
 0x1d4   :  { %v3218_v4 = vpop.eup %2244  ;;  %v590_v22 = vmax.f32 %v3200_v32, %v589_v55  ;;  %v601_v25 = vrot.slane %v3213_v28, 4  ;;  %v623_v23 = vrot.slane %v622_v12, 1  ;;  %v514_v18 = vmax.f32 %v512_v27, %v513_v43 }
 0x1d5   :  { %v627_v49 = vrot.slane %v626_v13, 2  ;;  %2260 = vtanh.f32 %v3113_v2  ;;  %v3228_v38 = vpop.eup %2246  ;;  %v672_v56 = vmax.f32 %v670_v36, %v671_v59  ;;  %v582_v16 = vmax.f32 %v580_v29, %v581_v15  ;;  %v406_v29 = vpop.xlane.xlu0 %405 }
 0x1d6   :  { %v609_v5 = vrot.slane %v608_v8, 2  ;;  %v673_v55 = vrot.slane %v3218_v4, 4  ;;  %v751_v37 = vmul.f32 1.442695, %v711_v24  ;;  %2262 = vtanh.f32 %v3156_v57  ;;  %v3233_v7 = vpop.eup %2248 }
 0x1d7   :  { %v591_v6 = vrot.slane %v590_v22, 2  ;;  %v596_v33 = vmax.f32 %v3210_v50, %v595_v60  ;;  %v739_v26 = vmul.f32 1.442695, %v705_v17  ;;  %v533_v27 = vrot.slane %v532_v3, 1  ;;  %v3239_v60 = vpop.eup %2250 }
 0x1d8   :  { %v586_v43 = vmax.f32 %v584_v1, %v585_v35  ;;  %v602_v2 = vmax.f32 %v3213_v28, %v601_v25  ;;  %v515_v63 = vrot.slane %v514_v18, 1  ;;  %v628_v52 = vmax.f32 %v626_v13, %v627_v49  ;;  %v3242_v25 = vpop.eup %2252 }
 0x1d9   :  { %v655_v36 = vrot.slane %v3228_v38, 4  ;;  %2264 = vtanh.f32 %v403_v42  ;;  %v624_v59 = vmax.f32 %v622_v12, %v623_v23  ;;  %v714_v15 = vsub.f32 %v3167_v30, %v582_v16  ;;  %v3244_v42 = vpop.eup %2254 }
 0x1da   :  { %v610_v57 = vmax.f32 %v608_v8, %v609_v5  ;;  %v674_v24 = vmax.f32 %v3218_v4, %v673_v55  ;;  %v729_v17 = vsub.f32 %v3160_v45, %v672_v56  ;;  %2266 = vpow2.f32 %v751_v37  ;;  %v3247_v23 = vpop.eup %2256 }
 0x1db   :  { %v592_v1 = vmax.f32 %v590_v22, %v591_v6  ;;  %v597_v35 = vrot.slane %v596_v33, 2  ;;  %v534_v13 = vmax.f32 %v532_v3, %v533_v27  ;;  %v587_v49 = vrot.slane %v586_v43, 1  ;;  %3987 = vst [vmem:[#allocation13_spill] sm:$0xff] %v3247_v23 }
 0x1dc   :  { %v603_v31 = vrot.slane %v602_v2, 2  ;;  %2268 = vtanh.f32 %v406_v29  ;;  %v516_v30 = vmax.f32 %v514_v18, %v515_v63  ;;  %v629_v12 = vrot.slane %v628_v52, 1 }
 0x1dd   :  { %2270 = vpow2.f32 %v755_v9  ;;  %v656_v8 = vmax.f32 %v3228_v38, %v655_v36  ;;  %v757_v16 = vmul.f32 1.442695, %v714_v15  ;;  %v611_v45 = vrot.slane %v610_v57, 1 }
 0x1de   :  { %v675_v37 = vrot.slane %v674_v24, 2  ;;  %v535_v22 = vrot.slane %v3239_v60, 4  ;;  %v787_v56 = vmul.f32 1.442695, %v729_v17  ;;  %v721_v3 = vsub.f32 %v3163_v14, %v624_v59 }
 0x1df   :  { %v593_v5 = vrot.slane %v592_v1, 1  ;;  %v598_v55 = vmax.f32 %v596_v33, %v597_v35  ;;  %v706_v6 = vsub.f32 %v3177_v34, %v534_v13  ;;  %v588_v27 = vmax.f32 %v586_v43, %v587_v49  ;;  %v3253_v9 = vpop.eup %2258 }
 0x1e0   :  { %2272 = vtanh.f32 %v3135_v62  ;;  %v604_v63 = vmax.f32 %v602_v2, %v603_v31  ;;  %v703_v18 = vsub.f32 %v3180_v39, %v516_v30  ;;  %v630_v36 = vmax.f32 %v628_v52, %v629_v12 }
 0x1e1   :  { %v657_v29 = vrot.slane %v656_v8, 2  ;;  %2274 = vtanh.f32 %v3186_v40  ;;  %v612_v14 = vmax.f32 %v610_v57, %v611_v45  ;;  %v676_v59 = vmax.f32 %v674_v24, %v675_v37 }
 0x1e2   :  { %v3257_v15 = vpop.eup %2260  ;;  %2276 = vpow2.f32 %v757_v16  ;;  %v536_v33 = vmax.f32 %v3239_v60, %v535_v22  ;;  %v771_v34 = vmul.f32 1.442695, %v721_v3  ;;  %v594_v43 = vmax.f32 %v592_v1, %v593_v5 }
 0x1e3   :  { %2278 = vpow2.f32 %v739_v26  ;;  %v599_v62 = vrot.slane %v598_v55, 1  ;;  %v3260_v31 = vpop.eup %2262  ;;  %v741_v2 = vmul.f32 1.442695, %v706_v6  ;;  %v715_v39 = vsub.f32 %v3191_v0, %v588_v27 }
 0x1e4   :  { %v541_v52 = vrot.slane %v3253_v9, 4  ;;  %v605_v17 = vrot.slane %v604_v63, 1  ;;  %2280 = vpow2.f32 %v787_v56  ;;  %v735_v40 = vmul.f32 1.442695, %v703_v18 }
 0x1e5   :  { %v658_v35 = vmax.f32 %v656_v8, %v657_v29  ;;  %v679_v57 = vrot.slane %v3257_v15, 4  ;;  %v722_v26 = vsub.f32 %v3196_v11, %v630_v36  ;;  %v719_v1 = vsub.f32 %v3198_v20, %v612_v14 }
 0x1e6   :  { %v3265_v24 = vpop.eup %2264  ;;  %v677_v13 = vrot.slane %v676_v59, 1  ;;  %v537_v49 = vrot.slane %v536_v33, 2  ;;  %2282 = vpow2.f32 %v771_v34  ;;  %v631_v30 = vrot.slane %v3260_v31, 4 }
 0x1e7   :  { %v716_v0 = vsub.f32 %v3200_v32, %v594_v43  ;;  %v600_v12 = vmax.f32 %v598_v55, %v599_v62  ;;  %v3271_v16 = vpop.eup %2266  ;;  %2284 = vpow2.f32 %v741_v2  ;;  %v759_v8 = vmul.f32 1.442695, %v715_v39 }
 0x1e8   :  { %v542_v45 = vmax.f32 %v3253_v9, %v541_v52  ;;  %v606_v37 = vmax.f32 %v604_v63, %v605_v17  ;;  %2286 = vpow2.f32 %v735_v40  ;;  %v659_v11 = vrot.slane %v658_v35, 1 }
 0x1e9   :  { %v3274_v22 = vpop.eup %2268  ;;  %v680_v20 = vmax.f32 %v3257_v15, %v679_v57  ;;  %v547_v56 = vrot.slane %v3265_v24, 4  ;;  %v773_v5 = vmul.f32 1.442695, %v722_v26  ;;  %v767_v32 = vmul.f32 1.442695, %v719_v1 }
 0x1ea   :  { %v3278_v3 = vpop.eup %2270  ;;  %v678_v55 = vmax.f32 %v676_v59, %v677_v13  ;;  %v538_v6 = vmax.f32 %v536_v33, %v537_v49  ;;  %v632_v27 = vmax.f32 %v3260_v31, %v631_v30  ;;  %v761_v18 = vmul.f32 1.442695, %v716_v0 }
 0x1eb   :  { %v717_v36 = vsub.f32 %v3210_v50, %v600_v12  ;;  %v847_v63 = vrot.slane %v3271_v16, 4  ;;  %2288 = vpow2.f32 %v759_v8  ;;  %v543_v29 = vrot.slane %v542_v45, 2 }
 0x1ec   :  { %v718_v14 = vsub.f32 %v3213_v28, %v606_v37  ;;  %v553_v34 = vrot.slane %v3274_v22, 4  ;;  %v660_v62 = vmax.f32 %v658_v35, %v659_v11  ;;  %v681_v2 = vrot.slane %v680_v20, 2  ;;  %v478_v35 = vpop.xlane.xlu1 %477  ;;  %v454_v37 = vpop.xlane.xlu0 %453 }
 0x1ed   :  { %v3285_v43 = vpop.eup %2272  ;;  %v548_v59 = vmax.f32 %v3265_v24, %v547_v56  ;;  %2290 = vtanh.f32 %v3158_v44  ;;  %v730_v50 = vsub.f32 %v3218_v4, %v678_v55  ;;  %v539_v39 = vrot.slane %v538_v6, 1 }
 0x1ee   :  { %v3289_v33 = vpop.eup %2274  ;;  %2292 = vtanh.f32 %v3223_v51  ;;  %v853_v52 = vrot.slane %v3233_v7, 4  ;;  %v633_v17 = vrot.slane %v632_v27, 2  ;;  %v763_v40 = vmul.f32 1.442695, %v717_v36 }
 0x1ef   :  { %v3294_v28 = vpop.eup %2276  ;;  %2294 = vpow2.f32 %v761_v18  ;;  %v848_v57 = vadd.f32 %v3271_v16, %v847_v63  ;;  %v544_v44 = vmax.f32 %v542_v45, %v543_v29  ;;  %v765_v1 = vmul.f32 1.442695, %v718_v14 }
 0x1f0   :  { %v3297_v26 = vpop.eup %2278  ;;  %v554_v13 = vmax.f32 %v3274_v22, %v553_v34  ;;  %v859_v4 = vrot.slane %v3278_v3, 4  ;;  %v727_v51 = vsub.f32 %v3228_v38, %v660_v62  ;;  %v685_v49 = vrot.slane %v3285_v43, 4 }
 0x1f1   :  { %v637_v30 = vrot.slane %v3289_v33, 4  ;;  %v549_v0 = vrot.slane %v548_v59, 2  ;;  %v3304_v12 = vpop.eup %2280  ;;  %v682_v8 = vmax.f32 %v680_v20, %v681_v2  ;;  %2296 = vtanh.f32 %v478_v35 }
 0x1f2   :  { %v854_v11 = vadd.f32 %v3233_v7, %v853_v52  ;;  %v865_v45 = vrot.slane %v3294_v28, 4  ;;  %v540_v56 = vmax.f32 %v538_v6, %v539_v39  ;;  %v634_v55 = vmax.f32 %v632_v27, %v633_v17 }
 0x1f3   :  { %2298 = vpow2.f32 %v763_v40  ;;  %v849_v18 = vrot.slane %v848_v57, 2  ;;  %v3308_v36 = vpop.eup %2282  ;;  %v545_v38 = vrot.slane %v544_v44, 1  ;;  %v555_v63 = vrot.slane %v554_v13, 2 }
 0x1f4   :  { %3988 = vst [vmem:[#allocation14_spill] sm:$0xff] %v3308_v36  ;;  %2300 = vpow2.f32 %v765_v1  ;;  %v860_v29 = vadd.f32 %v3278_v3, %v859_v4  ;;  %v3311_v14 = vpop.eup %2284  ;;  %v686_v20 = vmax.f32 %v3285_v43, %v685_v49  ;;  %v638_v34 = vmax.f32 %v3289_v33, %v637_v30 }
 0x1f5   :  { %v550_v62 = vmax.f32 %v548_v59, %v549_v0  ;;  %2302 = vtanh.f32 %v454_v37  ;;  %v3315_v2 = vpop.eup %2286  ;;  %v789_v6 = vmul.f32 1.442695, %v730_v50  ;;  %v855_v27 = vrot.slane %v854_v11, 2 }
 0x1f6   :  { %2304 = vpow2.f32 %v773_v5  ;;  %v866_v39 = vadd.f32 %v3294_v28, %v865_v45  ;;  %v783_v52 = vmul.f32 1.442695, %v727_v51  ;;  %v683_v17 = vrot.slane %v682_v8, 1 }
 0x1f7   :  { %2306 = vpow2.f32 %v767_v32  ;;  %v850_v40 = vadd.f32 %v849_v18, %v848_v57  ;;  %v707_v35 = vsub.f32 %v3239_v60, %v540_v56  ;;  %v546_v1 = vmax.f32 %v544_v44, %v545_v38 }
 0x1f8   :  { %v556_v4 = vmax.f32 %v554_v13, %v555_v63  ;;  %v861_v49 = vrot.slane %v860_v29, 2  ;;  %v3319_v21 = vpop.eup %2288  ;;  %v635_v59 = vrot.slane %v634_v55, 1  ;;  %v687_v30 = vrot.slane %v686_v20, 2 }
 0x1f9   :  { %v639_v0 = vrot.slane %v638_v34, 2  ;;  %v551_v37 = vrot.slane %v550_v62, 1  ;;  %2308 = vpow2.f32 %v789_v6  ;;  %v856_v50 = vadd.f32 %v855_v27, %v854_v11 }
 0x1fa   :  { %v3321_v5 = vpop.eup %2290  ;;  %v867_v45 = vrot.slane %v866_v39, 2  ;;  %2310 = vpow2.f32 %v783_v52  ;;  %v3325_v57 = vmax.f32 %v682_v8, %v683_v17  ;;  %v851_v60 = vrot.slane %v850_v40, 1 }
 0x1fb   :  { %v3323_v32 = vpop.eup %2292  ;;  %v743_v13 = vmul.f32 1.442695, %v707_v35  ;;  %v708_v51 = vsub.f32 %v3253_v9, %v546_v1  ;;  %v557_v56 = vrot.slane %v556_v4, 1  ;;  %v862_v18 = vadd.f32 %v861_v49, %v860_v29 }
 0x1fc   :  { %v3327_v44 = vpop.eup %2294  ;;  %v3330_v38 = vmax.f32 %v634_v55, %v635_v59  ;;  %v688_v63 = vmax.f32 %v686_v20, %v687_v30  ;;  %v640_v61 = vmax.f32 %v638_v34, %v639_v0  ;;  %v552_v6 = vmax.f32 %v550_v62, %v551_v37 }
 0x1fd   :  { %v691_v11 = vrot.slane %v3321_v5, 4  ;;  %v857_v27 = vrot.slane %v856_v50, 1  ;;  %v868_v48 = vadd.f32 %v867_v45, %v866_v39  ;;  %v871_v8 = vrot.slane %v3319_v21, 4 }
 0x1fe   :  { %v3334_v52 = vpop.eup %2296  ;;  %v731_v17 = vsub.f32 %v3257_v15, %v3325_v57  ;;  %v643_v9 = vrot.slane %v3323_v32, 4  ;;  %v852_v35 = vadd.f32 %v851_v60, %v850_v40  ;;  %v877_v55 = vrot.slane %v3327_v44, 4 }
 0x1ff   :  { %2312 = vpow2.f32 %v743_v13  ;;  %v745_v20 = vmul.f32 1.442695, %v708_v51  ;;  %v558_v34 = vmax.f32 %v556_v4, %v557_v56  ;;  %v863_v62 = vrot.slane %v862_v18, 1 }
 0x200   :  { %v3340_v29 = vpop.eup %2298  ;;  %v723_v39 = vsub.f32 %v3260_v31, %v3330_v38  ;;  %v689_v49 = vrot.slane %v688_v63, 1  ;;  %v641_v59 = vrot.slane %v640_v61, 1  ;;  %v709_v15 = vsub.f32 %v3265_v24, %v552_v6 }
 0x201   :  { %v3342_v1 = vpop.eup %2300  ;;  %v692_v40 = vmax.f32 %v3321_v5, %v691_v11  ;;  %v858_v0 = vadd.f32 %v857_v27, %v856_v50  ;;  %v869_v37 = vrot.slane %v868_v48, 1  ;;  %v872_v45 = vadd.f32 %v3319_v21, %v871_v8 }
 0x202   :  { %v3347_v30 = vpop.eup %2302  ;;  %v644_v4 = vmax.f32 %v3323_v32, %v643_v9  ;;  %v878_v60 = vadd.f32 %v3327_v44, %v877_v55  ;;  %v883_v31 = vrot.slane %v3340_v29, 4  ;;  %2314 = vrcp.f32 %v852_v35 }
 0x203   :  { %v3351_v57 = vpop.eup %2304  ;;  %2316 = vpow2.f32 %v745_v20  ;;  %v710_v24 = vsub.f32 %v3274_v22, %v558_v34  ;;  %v864_v51 = vadd.f32 %v863_v62, %v862_v18  ;;  %v889_v50 = vrot.slane %v3342_v1, 4 }
 0x204   :  { %3989 = vst [vmem:[#allocation15_spill] sm:$0xff] %v3351_v57  ;;  %v3356_v13 = vpop.eup %2306  ;;  %v747_v56 = vmul.f32 1.442695, %v709_v15  ;;  %v697_v38 = vrot.slane %v3334_v52, 4  ;;  %v649_v6 = vrot.slane %v3347_v30, 4  ;;  %v799_v11 = vrot.slane %v3315_v2, 4 }
 0x205   :  { %3990 = vst [vmem:[#allocation16_spill] sm:$0xff] %v3356_v13  ;;  %v690_v27 = vmax.f32 %v688_v63, %v689_v49  ;;  %v870_v8 = vadd.f32 %v869_v37, %v868_v48  ;;  %v873_v9 = vrot.slane %v872_v45, 2  ;;  %2318 = vrcp.f32 %v858_v0 }
 0x206   :  { %v3363_v35 = vpop.eup %2308  ;;  %v642_v55 = vmax.f32 %v640_v61, %v641_v59  ;;  %v693_v20 = vrot.slane %v692_v40, 2  ;;  %v879_v19 = vrot.slane %v878_v60, 2  ;;  %v884_v22 = vadd.f32 %v3340_v29, %v883_v31 }
 0x207   :  { %v3366_v18 = vpop.eup %2310  ;;  %v645_v34 = vrot.slane %v644_v4, 2  ;;  %v749_v62 = vmul.f32 1.442695, %v710_v24  ;;  %v890_v15 = vadd.f32 %v3342_v1, %v889_v50  ;;  %2320 = vrcp.f32 %v864_v51 }
 0x208   :  { %2322 = vpow2.f32 %v747_v56  ;;  %v698_v63 = vmax.f32 %v3334_v52, %v697_v38  ;;  %v650_v48 = vmax.f32 %v3347_v30, %v649_v6  ;;  %v800_v49 = vadd.f32 %v3315_v2, %v799_v11 }
 0x209   :  { %v791_v0 = vmul.f32 1.442695, %v731_v17  ;;  %v732_v61 = vsub.f32 %v3285_v43, %v690_v27  ;;  %v874_v59 = vadd.f32 %v873_v9, %v872_v45  ;;  %2324 = vrcp.f32 %v870_v8 }
 0x20a   :  { %v775_v37 = vmul.f32 1.442695, %v723_v39  ;;  %v724_v31 = vsub.f32 %v3289_v33, %v642_v55  ;;  %v880_v10 = vadd.f32 %v879_v19, %v878_v60  ;;  %v885_v24 = vrot.slane %v884_v22, 2 }
 0x20b   :  { %v694_v57 = vmax.f32 %v692_v40, %v693_v20  ;;  %v646_v50 = vmax.f32 %v644_v4, %v645_v34  ;;  %2326 = vpow2.f32 %v749_v62  ;;  %v891_v51 = vrot.slane %v890_v15, 2 }
 0x20c   :  { %v3374_v56 = vpop.eup %2312  ;;  %v699_v38 = vrot.slane %v698_v63, 2  ;;  %v651_v6 = vrot.slane %v650_v48, 2  ;;  %v801_v36 = vrot.slane %v800_v49, 2  ;;  %v805_v17 = vrot.slane %v3242_v25, 4 }
 0x20d   :  { %2328 = vpow2.f32 %v791_v0  ;;  %v793_v43 = vmul.f32 1.442695, %v732_v61  ;;  %v875_v45 = vrot.slane %v874_v59, 1  ;;  %v881_v39 = vrot.slane %v880_v10, 1 }
 0x20e   :  { %2330 = vpow2.f32 %v775_v37  ;;  %v886_v11 = vadd.f32 %v885_v24, %v884_v22  ;;  %v3377_v19 = vmul.f32 1.442695, %v724_v31  ;;  %v695_v40 = vrot.slane %v694_v57, 1 }
 0x20f   :  { %v2315_v33 = vpop.eup %2314  ;;  %v647_v4 = vrot.slane %v646_v50, 1  ;;  %v892_v60 = vadd.f32 %v891_v51, %v890_v15  ;;  %v700_v8 = vmax.f32 %v698_v63, %v699_v38  ;;  %v652_v9 = vmax.f32 %v650_v48, %v651_v6 }
 0x210   :  { %v3379_v27 = vpop.eup %2316  ;;  %v802_v55 = vadd.f32 %v801_v36, %v800_v49  ;;  %v806_v20 = vadd.f32 %v3242_v25, %v805_v17  ;;  %2332 = vpow2.f32 %v793_v43  ;;  %v876_v34 = vadd.f32 %v875_v45, %v874_v59 }
 0x211   :  { %v811_v62 = vrot.slane %v3297_v26, 4  ;;  %v817_v0 = vrot.slane %v3311_v14, 4  ;;  %v882_v61 = vadd.f32 %v881_v39, %v880_v10  ;;  %v887_v37 = vrot.slane %v886_v11, 1 }
 0x212   :  { %v2319_v22 = vpop.eup %2318  ;;  %v1031_v31 = vmul.f32 %v2315_v33, %v3271_v16  ;;  %v823_v15 = vrot.slane %v3374_v56, 4  ;;  %v696_v24 = vmax.f32 %v694_v57, %v695_v40  ;;  %v648_v51 = vmax.f32 %v646_v50, %v647_v4 }
 0x213   :  { %v893_v63 = vrot.slane %v892_v60, 1  ;;  %v829_v36 = vrot.slane %v3379_v27, 4  ;;  %v701_v49 = vrot.slane %v700_v8, 1  ;;  %v653_v38 = vrot.slane %v652_v9, 1 }
 0x214   :  { %v2321_v48 = vpop.eup %2320  ;;  %v803_v59 = vrot.slane %v802_v55, 1  ;;  %v807_v6 = vrot.slane %v806_v20, 2  ;;  %2334 = vrcp.f32 %v876_v34  ;;  %v1032_v10 = vmul.f32 %v2319_v22, %v3233_v7 }
 0x215   :  { %v3387_v17 = vpop.eup %2322  ;;  %v812_v43 = vadd.f32 %v3297_v26, %v811_v62  ;;  %v818_v16 = vadd.f32 %v3311_v14, %v817_v0  ;;  %v888_v57 = vadd.f32 %v887_v37, %v886_v11  ;;  %2336 = vrcp.f32 %v882_v61 }
 0x216   :  { %v2325_v45 = vpop.eup %2324  ;;  %v3991_v50 = vunpack.c.l.bf16 %v2562_v46  ;;  %v824_v33 = vadd.f32 %v3374_v56, %v823_v15  ;;  %v733_v40 = vsub.f32 %v3321_v5, %v696_v24  ;;  %v894_v4 = vadd.f32 %v893_v63, %v892_v60 }
 0x217   :  { %v1033_v23 = vmul.f32 %v2321_v48, %v3278_v3  ;;  %v830_v34 = vadd.f32 %v3379_v27, %v829_v36  ;;  %v702_v62 = vmax.f32 %v700_v8, %v701_v49  ;;  %v804_v22 = vadd.f32 %v803_v59, %v802_v55 }
 0x218   :  { %v1063_v39 = vmul.f32 %v3991_v50, %v1031_v31  ;;  %v3398_v7 = vpop.eup %2326  ;;  %v808_v0 = vadd.f32 %v807_v6, %v806_v20  ;;  %v835_v11 = vrot.slane %v3387_v17, 4  ;;  %v654_v61 = vmax.f32 %v652_v9, %v653_v38 }
 0x219   :  { %v1034_v37 = vmul.f32 %v2325_v45, %v3294_v28  ;;  %v3992_v31 = vunpack.c.h.bf16 %v2562_v46  ;;  %v813_v50 = vrot.slane %v812_v43, 2  ;;  %2338 = vrcp.f32 %v888_v57 }
 0x21a   :  { %v3404_v5 = vpop.eup %2328  ;;  %v1143_v3 = vsel %vm118_vm0, %v1063_v39, 0.0  ;;  %v819_v60 = vrot.slane %v818_v16, 2  ;;  %v825_v24 = vrot.slane %v824_v33, 2  ;;  %2340 = vrcp.f32 %v894_v4 }
 0x21b   :  { %v1064_v15 = vmul.f32 %v3992_v31, %v1032_v10  ;;  %v3407_v63 = vpop.eup %2330  ;;  %v3994_v8 = vunpack.c.l.bf16 %v2585_v53  ;;  %v831_v9 = vrot.slane %v830_v34, 2  ;;  %v841_v28 = vrot.slane %v3398_v7, 4 }
 0x21c   :  { %3993 = vst [vmem:[#allocation17_spill] sm:$0xff] %v3407_v63  ;;  %v725_v46 = vsub.f32 %v3323_v32, %v648_v51  ;;  %v809_v20 = vrot.slane %v808_v0, 1  ;;  %v836_v36 = vadd.f32 %v3387_v17, %v835_v11  ;;  %2342 = vrcp.f32 %v804_v22 }
 0x21d   :  { %v1065_v55 = vmul.f32 %v3994_v8, %v1033_v23  ;;  %v3995_v48 = vunpack.c.h.bf16 %v2585_v53  ;;  %v1144_v38 = vrot.slane %v1143_v3, 4  ;;  %v1150_v59 = vsel %vm118_vm0, %v1064_v15, 0.0  ;;  %v3417_v10 = vpop.eup %2332 }
 0x21e   :  { %v814_v6 = vadd.f32 %v813_v50, %v812_v43  ;;  %v795_v45 = vmul.f32 1.442695, %v733_v40  ;;  %v734_v23 = vsub.f32 %v3334_v52, %v702_v62  ;;  %v726_v57 = vsub.f32 %v3347_v30, %v654_v61 }
 0x21f   :  { %v1066_v49 = vmul.f32 %v3995_v48, %v1034_v37  ;;  %v820_v39 = vadd.f32 %v819_v60, %v818_v16  ;;  %v1157_v32 = vsel %vm118_vm0, %v1065_v55, 0.0  ;;  %v826_v51 = vadd.f32 %v825_v24, %v824_v33 }
 0x220   :  { %v832_v4 = vadd.f32 %v831_v9, %v830_v34  ;;  %v842_v22 = vadd.f32 %v3398_v7, %v841_v28  ;;  %2344 = vpow2.f32 %v3377_v19  ;;  %v1151_v53 = vrot.slane %v1150_v59, 4 }
 0x221   :  { %v810_v11 = vadd.f32 %v809_v20, %v808_v0  ;;  %v837_v37 = vrot.slane %v836_v36, 2  ;;  %v779_v43 = vmul.f32 1.442695, %v725_v46  ;;  %v1145_v31 = vadd.f32 %v1144_v38, %v1143_v3  ;;  %v2335_v52 = vpop.eup %2334 }
 0x222   :  { %v1164_v40 = vsel %vm118_vm0, %v1066_v49, 0.0  ;;  %v815_v15 = vrot.slane %v814_v6, 1  ;;  %2346 = vpow2.f32 %v795_v45  ;;  %v797_v30 = vmul.f32 1.442695, %v734_v23  ;;  %v2337_v61 = vpop.eup %2336 }
 0x223   :  { %v1158_v16 = vrot.slane %v1157_v32, 4  ;;  %v821_v62 = vrot.slane %v820_v39, 1  ;;  %v781_v33 = vmul.f32 1.442695, %v726_v57  ;;  %v827_v34 = vrot.slane %v826_v51, 1 }
 0x224   :  { %v833_v50 = vrot.slane %v832_v4, 1  ;;  %v843_v60 = vrot.slane %v842_v22, 2  ;;  %v1152_v24 = vadd.f32 %v1151_v53, %v1150_v59  ;;  %v1165_v19 = vrot.slane %v1164_v40, 4 }
 0x225   :  { %v838_v8 = vadd.f32 %v837_v37, %v836_v36  ;;  %2348 = vrcp.f32 %v810_v11  ;;  %v1035_v0 = vmul.f32 %v2335_v52, %v3319_v21  ;;  %v1146_v3 = vrot.slane %v1145_v31, 2 }
 0x226   :  { %2350 = vpow2.f32 %v779_v43  ;;  %v816_v55 = vadd.f32 %v815_v15, %v814_v6  ;;  %v1036_v9 = vmul.f32 %v2337_v61, %v3327_v44  ;;  %v1159_v28 = vadd.f32 %v1158_v16, %v1157_v32  ;;  %v2339_v20 = vpop.eup %2338 }
 0x227   :  { %2352 = vpow2.f32 %v797_v30  ;;  %v822_v46 = vadd.f32 %v821_v62, %v820_v39  ;;  %v828_v48 = vadd.f32 %v827_v34, %v826_v51  ;;  %v844_v49 = vadd.f32 %v843_v60, %v842_v22  ;;  %v2341_v59 = vpop.eup %2340 }
 0x228   :  { %2354 = vpow2.f32 %v781_v33  ;;  %v943_v38 = vrot.slane %v3366_v18, 4  ;;  %v1153_v45 = vrot.slane %v1152_v24, 2  ;;  %v1166_v36 = vadd.f32 %v1165_v19, %v1164_v40 }
 0x229   :  { %v834_v23 = vadd.f32 %v833_v50, %v832_v4  ;;  %v839_v57 = vrot.slane %v838_v8, 1  ;;  %v2343_v53 = vpop.eup %2342  ;;  %v3996_v21 = vunpack.c.l.bf16 %v2678_v58  ;;  %v1147_v11 = vadd.f32 %v1146_v3, %v1145_v31 }
 0x22a   :  { %2356 = vrcp.f32 %v816_v55  ;;  %v949_v44 = vrot.slane %v3244_v42, 4  ;;  %v1037_v39 = vmul.f32 %v2339_v20, %v3340_v29  ;;  %v3997_v32 = vunpack.c.h.bf16 %v2678_v58 }
 0x22b   :  { %v1067_v6 = vmul.f32 %v3996_v21, %v1035_v0  ;;  %v1160_v22 = vrot.slane %v1159_v28, 2  ;;  %2358 = vrcp.f32 %v822_v46  ;;  %v1038_v37 = vmul.f32 %v2341_v59, %v3342_v1 }
 0x22c   :  { %v1068_v51 = vmul.f32 %v3997_v32, %v1036_v9  ;;  %v845_v43 = vrot.slane %v844_v49, 1  ;;  %v944_v4 = vadd.f32 %v3366_v18, %v943_v38  ;;  %v955_v40 = vrot.slane %v3304_v12, 4 }
 0x22d   :  { %v1154_v15 = vadd.f32 %v1153_v45, %v1152_v24  ;;  %v840_v52 = vadd.f32 %v839_v57, %v838_v8  ;;  %v1023_v31 = vmul.f32 %v2343_v53, %v3315_v2  ;;  %v961_v30 = vrot.slane %v3363_v35, 4  ;;  %v3439_v16 = vpop.eup %2344 }
 0x22e   :  { %3998 = vst [vmem:[#allocation18_spill] sm:$0xff] %v3439_v16  ;;  %v1167_v29 = vrot.slane %v1166_v36, 2  ;;  %v1171_v58 = vsel %vm118_vm0, %v1067_v6, 0.0  ;;  %2360 = vrcp.f32 %v828_v48  ;;  %v950_v62 = vadd.f32 %v3244_v42, %v949_v44 }
 0x22f   :  { %v3999_v1 = vunpack.c.l.bf16 %v2719_v41  ;;  %v1148_v33 = vrot.slane %v1147_v11, 1  ;;  %v3445_v34 = vadd.f32 %v1160_v22, %v1159_v28  ;;  %v1178_v50 = vsel %vm118_vm0, %v1068_v51, 0.0  ;;  %v3448_v60 = vpop.eup %2346 }
 0x230   :  { %v4000_v2 = vunpack.c.h.bf16 %v2719_v41  ;;  %v846_v19 = vadd.f32 %v845_v43, %v844_v49  ;;  %v945_v8 = vrot.slane %v944_v4, 2  ;;  %v956_v0 = vadd.f32 %v3304_v12, %v955_v40 }
 0x231   :  { %v1069_v61 = vmul.f32 %v3999_v1, %v1037_v39  ;;  %v1172_v3 = vrot.slane %v1171_v58, 4  ;;  %2362 = vrcp.f32 %v834_v23  ;;  %v4001_v55 = vunpack.c.l.bf16 %v2567_v47 }
 0x232   :  { %v1070_v24 = vmul.f32 %v4000_v2, %v1038_v37  ;;  %v962_v46 = vadd.f32 %v3363_v35, %v961_v30  ;;  %v2349_v28 = vpop.eup %2348  ;;  %v1155_v20 = vrot.slane %v1154_v15, 1  ;;  %v3456_v48 = vadd.f32 %v1167_v29, %v1166_v36 }
 0x233   :  { %v1055_v9 = vmul.f32 %v4001_v55, %v1023_v31  ;;  %v1179_v38 = vrot.slane %v1178_v50, 4  ;;  %v951_v59 = vrot.slane %v950_v62, 2  ;;  %v3458_v45 = vpop.eup %2350  ;;  %v3460_v41 = vadd.f32 %v1148_v33, %v1147_v11 }
 0x234   :  { %v1185_v49 = vsel %vm118_vm0, %v1069_v61, 0.0  ;;  %2364 = vrcp.f32 %v840_v52  ;;  %v967_v23 = vrot.slane %v3404_v5, 4  ;;  %v3464_v57 = vpop.eup %2352  ;;  %v1192_v21 = vsel %vm118_vm0, %v1070_v24, 0.0 }
 0x235   :  { %4002 = vst [vmem:[#allocation19_spill] sm:$0xff] %v3460_v41  ;;  %4003 = vst [vmem:[#allocation20_spill] sm:$0xff] %v3464_v57  ;;  %v946_v6 = vadd.f32 %v945_v8, %v944_v4  ;;  %v957_v36 = vrot.slane %v956_v0, 2  ;;  %v3468_v44 = vpop.eup %2354  ;;  %v3470_v39 = vadd.f32 %v1172_v3, %v1171_v58  ;;  %v1024_v11 = vmul.f32 %v2349_v28, %v3242_v25 }
 0x236   :  { %v1087_v32 = vsel %vm118_vm0, %v1055_v9, 0.0  ;;  %v963_v51 = vrot.slane %v962_v46, 2  ;;  %v3474_v22 = vadd.f32 %v1179_v38, %v1178_v50  ;;  %v1186_v37 = vrot.slane %v1185_v49, 4 }
 0x237   :  { %2366 = vrcp.f32 %v846_v19  ;;  %v952_v43 = vadd.f32 %v951_v59, %v950_v62  ;;  %v2357_v40 = vpop.eup %2356  ;;  %v3476_v52 = vadd.f32 %v1155_v20, %v1154_v15  ;;  %v1193_v31 = vrot.slane %v1192_v21, 4 }
 0x238   :  { %v968_v4 = vadd.f32 %v3404_v5, %v967_v23  ;;  %v973_v30 = vrot.slane %v3417_v10, 4  ;;  %v2359_v29 = vpop.eup %2358  ;;  %v1088_v25 = vrot.slane %v1087_v32, 4  ;;  %v947_v1 = vrot.slane %v946_v6, 1 }
 0x239   :  { %4004 = vst [vmem:[#allocation21_spill] sm:$0xff] %v3476_v52  ;;  %v958_v61 = vadd.f32 %v957_v36, %v956_v0  ;;  %v4005_v50 = vunpack.c.h.bf16 %v2567_v47  ;;  %v964_v62 = vadd.f32 %v963_v51, %v962_v46  ;;  %v979_v15 = vrot.slane %v3448_v60, 4 }
 0x23a   :  { %v3486_v19 = vadd.f32 %v1186_v37, %v1185_v49  ;;  %v1025_v8 = vmul.f32 %v2357_v40, %v3297_v26  ;;  %v953_v3 = vrot.slane %v952_v43, 1  ;;  %v3489_v9 = vadd.f32 %v1193_v31, %v1192_v21 }
 0x23b   :  { %v1056_v2 = vmul.f32 %v4005_v50, %v1024_v11  ;;  %v2361_v55 = vpop.eup %2360  ;;  %v1026_v0 = vmul.f32 %v2359_v29, %v3311_v14  ;;  %v969_v28 = vrot.slane %v968_v4, 2  ;;  %v974_v20 = vadd.f32 %v3417_v10, %v973_v30 }
 0x23c   :  { %v3493_v47 = vadd.f32 %v1088_v25, %v1087_v32  ;;  %v3495_v46 = vadd.f32 %v947_v1, %v946_v6  ;;  %v959_v38 = vrot.slane %v958_v61, 1  ;;  %v985_v59 = vrot.slane %v3464_v57, 4  ;;  %v4007_v6 = vld [vmem:[#allocation13_spill] sm:$0xff]  ;;  %v4009_v25 = vld [vmem:[#allocation14_spill] sm:$0xff] }
 0x23d   :  { %v1094_v49 = vsel %vm118_vm0, %v1056_v2, 0.0  ;;  %v965_v23 = vrot.slane %v964_v62, 1  ;;  %v980_v26 = vadd.f32 %v3448_v60, %v979_v15  ;;  %v895_v21 = vrot.slane %v3356_v13, 4 }
 0x23e   :  { %v2363_v36 = vpop.eup %2362  ;;  %v1027_v14 = vmul.f32 %v2361_v55, %v3374_v56  ;;  %v4006_v11 = vunpack.c.l.bf16 %v2590_v54  ;;  %v3504_v32 = vadd.f32 %v953_v3, %v952_v43  ;;  %v901_v37 = vrot.slane %v4007_v6, 4  ;;  %v4010_v56 = vld [vmem:[#allocation15_spill] sm:$0xff] }
 0x23f   :  { %v4008_v40 = vunpack.c.h.bf16 %v2590_v54  ;;  %v970_v30 = vadd.f32 %v969_v28, %v968_v4  ;;  %v975_v29 = vrot.slane %v974_v20, 2  ;;  %v907_v1 = vrot.slane %v4009_v25, 4  ;;  %v4011_v54 = vld [vmem:[#allocation6_spill] sm:$0xff] }
 0x240   :  { %v1057_v51 = vmul.f32 %v4006_v11, %v1025_v8  ;;  %v1095_v2 = vrot.slane %v1094_v49, 4  ;;  %v960_v15 = vadd.f32 %v959_v38, %v958_v61  ;;  %v986_v58 = vadd.f32 %v3464_v57, %v985_v59 }
 0x241   :  { %v1058_v31 = vmul.f32 %v4008_v40, %v1026_v0  ;;  %v2365_v50 = vpop.eup %2364  ;;  %v913_v55 = vrot.slane %v4010_v56, 4  ;;  %v1028_v8 = vmul.f32 %v2363_v36, %v3379_v27  ;;  %v966_v43 = vadd.f32 %v965_v23, %v964_v62 }
 0x242   :  { %v896_v3 = vadd.f32 %v3356_v13, %v895_v21  ;;  %v919_v11 = vrot.slane %v3407_v63, 4  ;;  %v4012_v0 = vunpack.c.l.bf16 %v4011_v54  ;;  %v1101_v28 = vsel %vm118_vm0, %v1057_v51, 0.0 }
 0x243   :  { %v902_v40 = vadd.f32 %v4007_v6, %v901_v37  ;;  %v925_v61 = vrot.slane %v3439_v16, 4  ;;  %v1029_v59 = vmul.f32 %v2365_v50, %v3387_v17  ;;  %v971_v53 = vrot.slane %v970_v30, 1 }
 0x244   :  { %v1059_v4 = vmul.f32 %v4012_v0, %v1027_v14  ;;  %v2367_v38 = vpop.eup %2366  ;;  %v981_v24 = vrot.slane %v980_v26, 2  ;;  %v908_v27 = vadd.f32 %v4009_v25, %v907_v1  ;;  %v3522_v62 = vadd.f32 %v1095_v2, %v1094_v49 }
 0x245   :  { %v1108_v23 = vsel %vm118_vm0, %v1058_v31, 0.0  ;;  %v987_v21 = vrot.slane %v986_v58, 2  ;;  %v914_v36 = vadd.f32 %v4010_v56, %v913_v55  ;;  %v1102_v14 = vrot.slane %v1101_v28, 4 }
 0x246   :  { %v976_v51 = vadd.f32 %v975_v29, %v974_v20  ;;  %v897_v0 = vrot.slane %v896_v3, 2  ;;  %v920_v37 = vadd.f32 %v3407_v63, %v919_v11  ;;  %v1030_v33 = vmul.f32 %v2367_v38, %v3398_v7  ;;  %v4014_v11 = vld [vmem:[#allocation9_spill] sm:$0xff] }
 0x247   :  { %v903_v41 = vrot.slane %v902_v40, 2  ;;  %v926_v17 = vadd.f32 %v3439_v16, %v925_v61  ;;  %v931_v50 = vrot.slane %v3458_v45, 4  ;;  %v4013_v49 = vunpack.c.h.bf16 %v4011_v54 }
 0x248   :  { %v1109_v2 = vrot.slane %v1108_v23, 4  ;;  %v982_v31 = vadd.f32 %v981_v24, %v980_v26  ;;  %v909_v52 = vrot.slane %v908_v27, 2  ;;  %v1115_v55 = vsel %vm118_vm0, %v1059_v4, 0.0 }
 0x249   :  { %v1060_v1 = vmul.f32 %v4013_v49, %v1028_v8  ;;  %v988_v56 = vadd.f32 %v987_v21, %v986_v58  ;;  %v915_v20 = vrot.slane %v914_v36, 2  ;;  %v937_v29 = vrot.slane %v3468_v44, 4 }
 0x24a   :  { %v4015_v63 = vunpack.c.l.bf16 %v4014_v11  ;;  %v977_v38 = vrot.slane %v976_v51, 1  ;;  %v898_v25 = vadd.f32 %v897_v0, %v896_v3  ;;  %v921_v61 = vrot.slane %v920_v37, 2 }
 0x24b   :  { %v3536_v16 = vadd.f32 %v1102_v14, %v1101_v28  ;;  %v904_v6 = vadd.f32 %v903_v41, %v902_v40  ;;  %v927_v54 = vrot.slane %v926_v17, 2  ;;  %v932_v8 = vadd.f32 %v3458_v45, %v931_v50 }
 0x24c   :  { %v1061_v7 = vmul.f32 %v4015_v63, %v1029_v59  ;;  %v1116_v24 = vrot.slane %v1115_v55, 4  ;;  %v1122_v26 = vsel %vm118_vm0, %v1060_v1, 0.0  ;;  %v983_v4 = vrot.slane %v982_v31, 1 }
 0x24d   :  { %v910_v58 = vadd.f32 %v909_v52, %v908_v27  ;;  %v972_v21 = vadd.f32 %v971_v53, %v970_v30  ;;  %v989_v49 = vrot.slane %v988_v56, 1  ;;  %v916_v13 = vadd.f32 %v915_v20, %v914_v36 }
 0x24e   :  { %v938_v57 = vadd.f32 %v3468_v44, %v937_v29  ;;  %v978_v63 = vadd.f32 %v977_v38, %v976_v51  ;;  %2368 = vrcp.f32 %v3495_v46  ;;  %v899_v3 = vrot.slane %v898_v25, 1 }
 0x24f   :  { %v922_v28 = vadd.f32 %v921_v61, %v920_v37  ;;  %2370 = vrcp.f32 %v3504_v32  ;;  %v905_v41 = vrot.slane %v904_v6, 1  ;;  %v928_v40 = vadd.f32 %v927_v54, %v926_v17 }
 0x250   :  { %v933_v59 = vrot.slane %v932_v8, 2  ;;  %v4016_v14 = vunpack.c.h.bf16 %v4014_v11  ;;  %v984_v50 = vadd.f32 %v983_v4, %v982_v31  ;;  %2372 = vrcp.f32 %v960_v15 }
 0x251   :  { %v911_v53 = vrot.slane %v910_v58, 1  ;;  %v990_v52 = vadd.f32 %v989_v49, %v988_v56  ;;  %2374 = vrcp.f32 %v966_v43  ;;  %v917_v30 = vrot.slane %v916_v13, 1 }
 0x252   :  { %v1062_v0 = vmul.f32 %v4016_v14, %v1030_v33  ;;  %v939_v27 = vrot.slane %v938_v57, 2  ;;  %v1123_v36 = vrot.slane %v1122_v26, 4  ;;  %2376 = vrcp.f32 %v972_v21 }
 0x253   :  { %v900_v46 = vadd.f32 %v899_v3, %v898_v25  ;;  %v923_v51 = vrot.slane %v922_v28, 1  ;;  %2378 = vrcp.f32 %v978_v63  ;;  %v906_v37 = vadd.f32 %v905_v41, %v904_v6 }
 0x254   :  { %v929_v32 = vrot.slane %v928_v40, 1  ;;  %v934_v1 = vadd.f32 %v933_v59, %v932_v8  ;;  %v1110_v17 = vadd.f32 %v1109_v2, %v1108_v23  ;;  %v1129_v20 = vsel %vm118_vm0, %v1061_v7, 0.0 }
 0x255   :  { %2380 = vrcp.f32 %v984_v50  ;;  %v912_v33 = vadd.f32 %v911_v53, %v910_v58  ;;  %v1136_v15 = vsel %vm118_vm0, %v1062_v0, 0.0  ;;  %v918_v56 = vadd.f32 %v917_v30, %v916_v13 }
 0x256   :  { %2382 = vrcp.f32 %v990_v52  ;;  %v940_v43 = vadd.f32 %v939_v27, %v938_v57  ;;  %v1117_v31 = vadd.f32 %v1116_v24, %v1115_v55  ;;  %v1124_v29 = vadd.f32 %v1123_v36, %v1122_v26 }
 0x257   :  { %v924_v11 = vadd.f32 %v923_v51, %v922_v28  ;;  %2384 = vrcp.f32 %v900_v46  ;;  %v1130_v25 = vrot.slane %v1129_v20, 4  ;;  %v930_v38 = vadd.f32 %v929_v32, %v928_v40 }
 0x258   :  { %v935_v61 = vrot.slane %v934_v1, 1  ;;  %2386 = vrcp.f32 %v906_v37  ;;  %v1188_v6 = vrot.slane %v3486_v19, 2  ;;  %v1195_v23 = vrot.slane %v3489_v9, 2 }
 0x259   :  { %v1137_v2 = vrot.slane %v1136_v15, 4  ;;  %2388 = vrcp.f32 %v912_v33  ;;  %v1090_v7 = vrot.slane %v3493_v47, 2  ;;  %v1097_v54 = vrot.slane %v3522_v62, 2 }
 0x25a   :  { %v941_v13 = vrot.slane %v940_v43, 1  ;;  %2390 = vrcp.f32 %v918_v56  ;;  %v1104_v57 = vrot.slane %v3536_v16, 2  ;;  %v1111_v55 = vrot.slane %v1110_v17, 2 }
 0x25b   :  { %v1118_v8 = vrot.slane %v1117_v31, 2  ;;  %2392 = vrcp.f32 %v924_v11  ;;  %v2369_v24 = vpop.eup %2368  ;;  %v1125_v26 = vrot.slane %v1124_v29, 2  ;;  %v1131_v4 = vadd.f32 %v1130_v25, %v1129_v20 }
 0x25c   :  { %v936_v58 = vadd.f32 %v935_v61, %v934_v1  ;;  %2394 = vrcp.f32 %v930_v38  ;;  %v2371_v21 = vpop.eup %2370  ;;  %v4017_v49 = vrot.slane %v3470_v39, 2  ;;  %v4018_v3 = vrot.slane %v3474_v22, 2  ;;  %v4021_v61 = vld [vmem:[#allocation2_spill] sm:$0xff] }
 0x25d   :  { %v1189_v41 = vadd.f32 %v1188_v6, %v3486_v19  ;;  %v1138_v40 = vadd.f32 %v1137_v2, %v1136_v15  ;;  %v2373_v59 = vpop.eup %2372  ;;  %v4019_v14 = vrot.slane %v3445_v34, 1  ;;  %v1196_v50 = vadd.f32 %v1195_v23, %v3489_v9 }
 0x25e   :  { %v1175_v63 = vadd.f32 %v4017_v49, %v3470_v39  ;;  %v1182_v28 = vadd.f32 %v4018_v3, %v3474_v22  ;;  %v1091_v53 = vadd.f32 %v1090_v7, %v3493_v47  ;;  %v942_v52 = vadd.f32 %v941_v13, %v940_v43  ;;  %v2375_v30 = vpop.eup %2374 }
 0x25f   :  { %v3562_v0 = vadd.f32 %v4019_v14, %v3445_v34  ;;  %v1098_v39 = vadd.f32 %v1097_v54, %v3522_v62  ;;  %v1105_v27 = vadd.f32 %v1104_v57, %v3536_v16  ;;  %v1112_v22 = vadd.f32 %v1111_v55, %v1110_v17  ;;  %v2377_v19 = vpop.eup %2376 }
 0x260   :  { %v1119_v36 = vadd.f32 %v1118_v8, %v1117_v31  ;;  %v1126_v46 = vadd.f32 %v1125_v26, %v1124_v29  ;;  %v1132_v51 = vrot.slane %v1131_v4, 2  ;;  %v1047_v37 = vmul.f32 %v2369_v24, %v3366_v18  ;;  %v2379_v34 = vpop.eup %2378 }
 0x261   :  { %2396 = vrcp.f32 %v936_v58  ;;  %v1176_v32 = vrot.slane %v1175_v63, 1  ;;  %v1183_v1 = vrot.slane %v1182_v28, 1  ;;  %v1190_v9 = vrot.slane %v1189_v41, 1 }
 0x262   :  { %v1139_v20 = vrot.slane %v1138_v40, 2  ;;  %v2381_v47 = vpop.eup %2380  ;;  %v1197_v33 = vrot.slane %v1196_v50, 1  ;;  %v1092_v15 = vrot.slane %v1091_v53, 1  ;;  %v1048_v62 = vmul.f32 %v2371_v21, %v3244_v42 }
 0x263   :  { %2398 = vrcp.f32 %v942_v52  ;;  %v2383_v16 = vpop.eup %2382  ;;  %v1099_v17 = vrot.slane %v1098_v39, 1  ;;  %v1106_v56 = vrot.slane %v1105_v27, 1  ;;  %v1113_v43 = vrot.slane %v1112_v22, 1  ;;  %v4027_v52 = vld [vmem:[#allocation4_spill] sm:$0xff] }
 0x264   :  { %v1120_v31 = vrot.slane %v1119_v36, 1  ;;  %v2385_v29 = vpop.eup %2384  ;;  %v4020_v18 = vrot.slane %v3456_v48, 1  ;;  %v1127_v25 = vrot.slane %v1126_v46, 1  ;;  %v1133_v38 = vadd.f32 %v1132_v51, %v1131_v4 }
 0x265   :  { %v4022_v6 = vunpack.c.l.bf16 %v4021_v61  ;;  %v2387_v2 = vpop.eup %2386  ;;  %v3577_v7 = vadd.f32 %v1176_v32, %v1175_v63  ;;  %v3579_v42 = vadd.f32 %v1183_v1, %v1182_v28  ;;  %v1140_v54 = vadd.f32 %v1139_v20, %v1138_v40 }
 0x266   :  { %v3573_v11 = vadd.f32 %v4020_v18, %v3456_v48  ;;  %v1049_v13 = vmul.f32 %v2373_v59, %v3304_v12  ;;  %v2389_v57 = vpop.eup %2388  ;;  %v3582_v55 = vadd.f32 %v1190_v9, %v1189_v41  ;;  %v3584_v8 = vadd.f32 %v1197_v33, %v1196_v50  ;;  %v4032_v9 = vld [vmem:[#allocation14_spill] sm:$0xff]  ;;  %v4033_v33 = vld [vmem:[#allocation15_spill] sm:$0xff] }
 0x267   :  { %v1079_v23 = vmul.f32 %v4022_v6, %v1047_v37  ;;  %v3586_v48 = vadd.f32 %v1092_v15, %v1091_v53  ;;  %v4025_v24 = vunpack.c.h.bf16 %v4021_v61  ;;  %v2391_v4 = vpop.eup %2390  ;;  %v3590_v58 = vadd.f32 %v1099_v17, %v1098_v39  ;;  %v4030_v37 = vld [vmem:[#allocation16_spill] sm:$0xff]  ;;  %v4036_v15 = vld [vmem:[#allocation17_spill] sm:$0xff]  ;;  %v4042_v61 = vld [vmem:[#allocation10_spill] sm:$0xff] }
 0x268   :  { %4023 = vst [vmem:[#allocation6_spill] sm:$0xff] %v3582_v55  ;;  %4024 = vst [vmem:[#allocation9_spill] sm:$0xff] %v3584_v8  ;;  %v3592_v21 = vadd.f32 %v1106_v56, %v1105_v27  ;;  %v3594_v49 = vadd.f32 %v1113_v43, %v1112_v22  ;;  %v3596_v63 = vadd.f32 %v1120_v31, %v1119_v36  ;;  %v2393_v12 = vpop.eup %2392  ;;  %v1134_v28 = vrot.slane %v1133_v38, 1  ;;  %v4029_v36 = vld [vmem:[#allocation20_spill] sm:$0xff]  ;;  %v4039_v56 = vld [vmem:[#allocation7_spill] sm:$0xff] }
 0x269   :  { %v1080_v26 = vmul.f32 %v4025_v24, %v1048_v62  ;;  %v3598_v3 = vadd.f32 %v1127_v25, %v1126_v46  ;;  %v1050_v41 = vmul.f32 %v2375_v30, %v3363_v35  ;;  %v1255_v40 = vsel %vm118_vm0, %v1079_v23, 0.0  ;;  %v2395_v59 = vpop.eup %2394  ;;  %v4031_v30 = vld [vmem:[#allocation13_spill] sm:$0xff] }
 0x26a   :  { %v1141_v14 = vrot.slane %v1140_v54, 1  ;;  %v1051_v50 = vmul.f32 %v2377_v19, %v3404_v5  ;;  %v1052_v53 = vmul.f32 %v2379_v34, %v3417_v10  ;;  %v4028_v39 = vunpack.c.l.bf16 %v4027_v52 }
 0x26b   :  { %4026 = vst [vmem:[#allocation2_spill] sm:$0xff] %v3598_v3  ;;  %v1053_v22 = vmul.f32 %v2381_v47, %v3448_v60  ;;  %v1054_v51 = vmul.f32 %v2383_v16, %v4029_v36  ;;  %v1262_v46 = vsel %vm118_vm0, %v1080_v26, 0.0  ;;  %v1039_v32 = vmul.f32 %v2385_v29, %v4030_v37  ;;  %v4037_v47 = vld [vmem:[#allocation18_spill] sm:$0xff] }
 0x26c   :  { %v1081_v27 = vmul.f32 %v4028_v39, %v1049_v13  ;;  %v1256_v35 = vrot.slane %v1255_v40, 4  ;;  %v1040_v1 = vmul.f32 %v2387_v2, %v4031_v30  ;;  %v1041_v20 = vmul.f32 %v2389_v57, %v4032_v9  ;;  %v4045_v57 = vld [vmem:[#allocation3_spill] sm:$0xff] }
 0x26d   :  { %v1042_v5 = vmul.f32 %v2391_v4, %v4033_v33  ;;  %v3613_v19 = vadd.f32 %v1134_v28, %v1133_v38  ;;  %v4035_v10 = vunpack.c.h.bf16 %v4027_v52  ;;  %v1043_v60 = vmul.f32 %v2393_v12, %v4036_v15  ;;  %v4054_v15 = vld [vmem:[#allocation11_spill] sm:$0xff] }
 0x26e   :  { %v1044_v62 = vmul.f32 %v2395_v59, %v4037_v47  ;;  %v2397_v16 = vpop.eup %2396  ;;  %v3619_v17 = vadd.f32 %v1141_v14, %v1140_v54  ;;  %v4040_v43 = vunpack.c.l.bf16 %v4039_v56  ;;  %v4041_v29 = vunpack.c.h.bf16 %v4039_v56 }
 0x26f   :  { %4034 = vst [vmem:[#allocation4_spill] sm:$0xff] %v3613_v19  ;;  %v1082_v34 = vmul.f32 %v4035_v10, %v1050_v41  ;;  %v1263_v25 = vrot.slane %v1262_v46, 4  ;;  %v4043_v38 = vunpack.c.l.bf16 %v4042_v61  ;;  %v4044_v23 = vunpack.c.h.bf16 %v4042_v61  ;;  %v4048_v41 = vld [vmem:[#allocation5_spill] sm:$0xff] }
 0x270   :  { %4038 = vst [vmem:[#allocation20_spill] sm:$0xff] %v3619_v17  ;;  %v1083_v31 = vmul.f32 %v4040_v43, %v1051_v50  ;;  %v1084_v18 = vmul.f32 %v4041_v29, %v1052_v53  ;;  %v1269_v13 = vsel %vm118_vm0, %v1081_v27, 0.0  ;;  %v4046_v24 = vunpack.c.l.bf16 %v4045_v57  ;;  %v2399_v54 = vpop.eup %2398 }
 0x271   :  { %v1085_v6 = vmul.f32 %v4043_v38, %v1053_v22  ;;  %v1086_v2 = vmul.f32 %v4044_v23, %v1054_v51  ;;  %v1257_v4 = vadd.f32 %v1256_v35, %v1255_v40  ;;  %v4047_v12 = vunpack.c.h.bf16 %v4045_v57  ;;  %v4051_v22 = vld [vmem:[#allocation8_spill] sm:$0xff] }
 0x272   :  { %v1071_v26 = vmul.f32 %v4046_v24, %v1039_v32  ;;  %v4049_v59 = vunpack.c.l.bf16 %v4048_v41  ;;  %v4050_v50 = vunpack.c.h.bf16 %v4048_v41  ;;  %v1276_v52 = vsel %vm118_vm0, %v1082_v34, 0.0 }
 0x273   :  { %v1072_v28 = vmul.f32 %v4047_v12, %v1040_v1  ;;  %v1045_v39 = vmul.f32 %v2397_v16, %v3458_v45  ;;  %v4052_v27 = vunpack.c.l.bf16 %v4051_v22  ;;  %v4053_v51 = vunpack.c.h.bf16 %v4051_v22 }
 0x274   :  { %v1073_v14 = vmul.f32 %v4049_v59, %v1041_v20  ;;  %v1074_v53 = vmul.f32 %v4050_v50, %v1042_v5  ;;  %v1264_v40 = vadd.f32 %v1263_v25, %v1262_v46  ;;  %v1270_v32 = vrot.slane %v1269_v13, 4 }
 0x275   :  { %v1075_v36 = vmul.f32 %v4052_v27, %v1043_v60  ;;  %v1076_v37 = vmul.f32 %v4053_v51, %v1044_v62  ;;  %v1283_v35 = vsel %vm118_vm0, %v1083_v31, 0.0  ;;  %v1290_v30 = vsel %vm118_vm0, %v1084_v18, 0.0 }
 0x276   :  { %v1297_v1 = vsel %vm118_vm0, %v1085_v6, 0.0  ;;  %v1304_v9 = vsel %vm118_vm0, %v1086_v2, 0.0  ;;  %v1046_v20 = vmul.f32 %v2399_v54, %v3468_v44  ;;  %v1199_v45 = vsel %vm118_vm0, %v1071_v26, 0.0 }
 0x277   :  { %v1277_v33 = vrot.slane %v1276_v52, 4  ;;  %v1206_v5 = vsel %vm118_vm0, %v1072_v28, 0.0  ;;  %v1213_v10 = vsel %vm118_vm0, %v1073_v14, 0.0  ;;  %v1220_v46 = vsel %vm118_vm0, %v1074_v53, 0.0 }
 0x278   :  { %v1284_v34 = vrot.slane %v1283_v35, 4  ;;  %v4055_v60 = vunpack.c.l.bf16 %v4054_v15  ;;  %v1227_v62 = vsel %vm118_vm0, %v1075_v36, 0.0  ;;  %v1234_v16 = vsel %vm118_vm0, %v1076_v37, 0.0 }
 0x279   :  { %v1291_v56 = vrot.slane %v1290_v30, 4  ;;  %v1298_v43 = vrot.slane %v1297_v1, 4  ;;  %v1305_v44 = vrot.slane %v1304_v9, 4  ;;  %v1200_v31 = vrot.slane %v1199_v45, 4 }
 0x27a   :  { %v1077_v47 = vmul.f32 %v4055_v60, %v1045_v39  ;;  %v4056_v29 = vunpack.c.h.bf16 %v4054_v15  ;;  %v1207_v25 = vrot.slane %v1206_v5, 4  ;;  %v1214_v61 = vrot.slane %v1213_v10, 4 }
 0x27b   :  { %v1221_v38 = vrot.slane %v1220_v46, 4  ;;  %v1258_v6 = vrot.slane %v1257_v4, 2  ;;  %v1271_v23 = vadd.f32 %v1270_v32, %v1269_v13  ;;  %v1228_v2 = vrot.slane %v1227_v62, 4 }
 0x27c   :  { %v1078_v18 = vmul.f32 %v4056_v29, %v1046_v20  ;;  %v1235_v57 = vrot.slane %v1234_v16, 4  ;;  %v1265_v24 = vrot.slane %v1264_v40, 2  ;;  %v1278_v26 = vadd.f32 %v1277_v33, %v1276_v52 }
 0x27d   :  { %v1285_v54 = vadd.f32 %v1284_v34, %v1283_v35  ;;  %v1241_v12 = vsel %vm118_vm0, %v1077_v47, 0.0  ;;  %v1292_v28 = vadd.f32 %v1291_v56, %v1290_v30  ;;  %v1299_v41 = vadd.f32 %v1298_v43, %v1297_v1 }
 0x27e   :  { %v1306_v59 = vadd.f32 %v1305_v44, %v1304_v9  ;;  %v1201_v14 = vadd.f32 %v1200_v31, %v1199_v45  ;;  %v1208_v50 = vadd.f32 %v1207_v25, %v1206_v5  ;;  %v1215_v53 = vadd.f32 %v1214_v61, %v1213_v10 }
 0x27f   :  { %v1222_v39 = vadd.f32 %v1221_v38, %v1220_v46  ;;  %v1248_v22 = vsel %vm118_vm0, %v1078_v18, 0.0  ;;  %v1259_v27 = vadd.f32 %v1258_v6, %v1257_v4  ;;  %v1229_v36 = vadd.f32 %v1228_v2, %v1227_v62 }
 0x280   :  { %v1236_v51 = vadd.f32 %v1235_v57, %v1234_v16  ;;  %v1242_v13 = vrot.slane %v1241_v12, 4  ;;  %v1266_v37 = vadd.f32 %v1265_v24, %v1264_v40  ;;  %v1272_v32 = vrot.slane %v1271_v23, 2 }
 0x281   :  { %v1279_v20 = vrot.slane %v1278_v26, 2  ;;  %v1286_v52 = vrot.slane %v1285_v54, 2  ;;  %v1293_v35 = vrot.slane %v1292_v28, 2  ;;  %v1300_v33 = vrot.slane %v1299_v41, 2 }
 0x282   :  { %v1307_v34 = vrot.slane %v1306_v59, 2  ;;  %v1249_v30 = vrot.slane %v1248_v22, 4  ;;  %v1202_v1 = vrot.slane %v1201_v14, 2  ;;  %v1209_v9 = vrot.slane %v1208_v50, 2 }
 0x283   :  { %v1216_v45 = vrot.slane %v1215_v53, 2  ;;  %v1223_v5 = vrot.slane %v1222_v39, 2  ;;  %v1260_v10 = vrot.slane %v1259_v27, 1  ;;  %v1230_v46 = vrot.slane %v1229_v36, 2 }
 0x284   :  { %v1237_v15 = vrot.slane %v1236_v51, 2  ;;  %v1243_v60 = vadd.f32 %v1242_v13, %v1241_v12  ;;  %v1267_v4 = vrot.slane %v1266_v37, 1  ;;  %v1273_v47 = vadd.f32 %v1272_v32, %v1271_v23 }
 0x285   :  { %v1280_v62 = vadd.f32 %v1279_v20, %v1278_v26  ;;  %v1287_v16 = vadd.f32 %v1286_v52, %v1285_v54  ;;  %v1294_v40 = vadd.f32 %v1293_v35, %v1292_v28  ;;  %v1301_v56 = vadd.f32 %v1300_v33, %v1299_v41 }
 0x286   :  { %v1308_v43 = vadd.f32 %v1307_v34, %v1306_v59  ;;  %v1250_v44 = vadd.f32 %v1249_v30, %v1248_v22  ;;  %v1203_v31 = vadd.f32 %v1202_v1, %v1201_v14  ;;  %v1210_v29 = vadd.f32 %v1209_v9, %v1208_v50 }
 0x287   :  { %v1217_v18 = vadd.f32 %v1216_v45, %v1215_v53  ;;  %v1224_v25 = vadd.f32 %v1223_v5, %v1222_v39  ;;  %v3661_v61 = vadd.f32 %v1260_v10, %v1259_v27  ;;  %v1231_v38 = vadd.f32 %v1230_v46, %v1229_v36 }
 0x288   :  { %v1238_v6 = vadd.f32 %v1237_v15, %v1236_v51  ;;  %v1244_v2 = vrot.slane %v1243_v60, 2  ;;  %v3663_v24 = vadd.f32 %v1267_v4, %v1266_v37  ;;  %v1274_v12 = vrot.slane %v1273_v47, 1 }
 0x289   :  { %v1281_v23 = vrot.slane %v1280_v62, 1  ;;  %v1288_v26 = vrot.slane %v1287_v16, 1  ;;  %v1295_v28 = vrot.slane %v1294_v40, 1  ;;  %v1302_v41 = vrot.slane %v1301_v56, 1 }
 0x28a   :  { %v1309_v59 = vrot.slane %v1308_v43, 1  ;;  %v1251_v22 = vrot.slane %v1250_v44, 2  ;;  %v1204_v50 = vrot.slane %v1203_v31, 1  ;;  %v1211_v53 = vrot.slane %v1210_v29, 1 }
 0x28b   :  { %v2113_v57 = vpop.f32.mrf.mxu0  ;;  %v1218_v39 = vrot.slane %v1217_v18, 1  ;;  %v1225_v27 = vrot.slane %v1224_v25, 1  ;;  %v1232_v51 = vrot.slane %v1231_v38, 1  ;;  %v1239_v32 = vrot.slane %v1238_v6, 1 }
 0x28c   :  { %v2148_v54 = vpop.f32.mrf.mxu1  ;;  %v3665_v20 = vadd.f32 %v1244_v2, %v1243_v60  ;;  %v3667_v52 = vadd.f32 %v1274_v12, %v1273_v47  ;;  %v3669_v35 = vadd.f32 %v1281_v23, %v1280_v62  ;;  %v3671_v33 = vadd.f32 %v1288_v26, %v1287_v16 }
 0x28d   :  { %v2114_v14 = vpop.f32.mrf.mxu0  ;;  %v3673_v34 = vadd.f32 %v1295_v28, %v1294_v40  ;;  %v3675_v30 = vadd.f32 %v1302_v41, %v1301_v56  ;;  %v3677_v1 = vadd.f32 %v1309_v59, %v1308_v43  ;;  %v3679_v9 = vadd.f32 %v1251_v22, %v1250_v44 }
 0x28e   :  { %v2115_v13 = vadd.f32 %v2114_v14, %v2113_v57  ;;  %v2149_v36 = vpop.f32.mrf.mxu1  ;;  %v3683_v5 = vadd.f32 %v1204_v50, %v1203_v31  ;;  %v3685_v10 = vadd.f32 %v1211_v53, %v1210_v29  ;;  %v3687_v46 = vadd.f32 %v1218_v39, %v1217_v18  ;;  %v4057_v18 = vld [vmem:[#allocation21_spill] sm:$0xff]  ;;  %v4058_v57 = vld [vmem:[#allocation19_spill] sm:$0xff] }
 0x28f   :  { %v2150_v37 = vadd.f32 %v2149_v36, %v2148_v54  ;;  %v3689_v15 = vadd.f32 %v1225_v27, %v1224_v25  ;;  %v3691_v60 = vadd.f32 %v1232_v51, %v1231_v38  ;;  %v3693_v4 = vadd.f32 %v1239_v32, %v1238_v6 }
 0x290   :  { %v1253_v29 = vrot.slane %v3679_v9, 1 }
 0x291   :  { %v3681_v45 = vadd.f32 %v2150_v37, %v2115_v13 }
 0x293   :  { %v3697_v62 = vrot.slane %v3681_v45, 1  ;;  %v3700_v16 = vrot.slane %v3681_v45, 2  ;;  %v3703_v40 = vrot.slane %v3681_v45, 3  ;;  %v3706_v56 = vrot.slane %v3681_v45, 4 }
 0x294   :  { %v3709_v43 = vrot.slane %v3681_v45, 5  ;;  %v3712_v44 = vrot.slane %v3681_v45, 6  ;;  %v3715_v31 = vrot.slane %v3681_v45, 7  ;;  %v1747_v12 = vmul.f32 %v3681_v45, %v4058_v57 }
 0x295   :  { %v1748_v25 = vmul.f32 %v3697_v62, %v4057_v18  ;;  %v1749_v38 = vmul.f32 %v3700_v16, %v3562_v0  ;;  %v1750_v6 = vmul.f32 %v3703_v40, %v3573_v11  ;;  %v1751_v2 = vmul.f32 %v3706_v56, %v3577_v7 }
 0x296   :  { %v1752_v23 = vmul.f32 %v3709_v43, %v3579_v42  ;;  %v1753_v26 = vmul.f32 %v3712_v44, %v3582_v55  ;;  %v1754_v54 = vmul.f32 %v3715_v31, %v3584_v8  ;;  %v1739_v22 = vmul.f32 %v3681_v45, %v3586_v48 }
 0x297   :  { %v1817_v28 = vrot.slane %v1748_v25, 7  ;;  %v1819_v41 = vrot.slane %v1749_v38, 6  ;;  %v1821_v59 = vrot.slane %v1750_v6, 5  ;;  %v1823_v14 = vrot.slane %v1751_v2, 4 }
 0x298   :  { %v1825_v50 = vrot.slane %v1752_v23, 3  ;;  %v1827_v53 = vrot.slane %v1753_v26, 2  ;;  %v1740_v39 = vmul.f32 %v3697_v62, %v3590_v58  ;;  %v1741_v13 = vmul.f32 %v3700_v16, %v3592_v21 }
 0x299   :  { %v1818_v27 = vsel %vm1357_vm1, %v1817_v28, %v1747_v12  ;;  %v1742_v36 = vmul.f32 %v3703_v40, %v3594_v49  ;;  %v1743_v51 = vmul.f32 %v3706_v56, %v3596_v63  ;;  %v1744_v37 = vmul.f32 %v3709_v43, %v3598_v3 }
 0x29a   :  { %v1820_v32 = vsel %vm1359_vm2, %v1819_v41, %v1818_v27  ;;  %v1745_v25 = vmul.f32 %v3712_v44, %v3613_v19  ;;  %v1746_v38 = vmul.f32 %v3715_v31, %v3619_v17  ;;  %v1829_v2 = vrot.slane %v1754_v54, 1 }
 0x29b   :  { %v1822_v6 = vsel %vm1361_vm3, %v1821_v59, %v1820_v32  ;;  %v1803_v12 = vrot.slane %v1740_v39, 7  ;;  %v1805_v23 = vrot.slane %v1741_v13, 6  ;;  %v1807_v28 = vrot.slane %v1742_v36, 5 }
 0x29c   :  { %v1824_v26 = vsel %vm1363_vm4, %v1823_v14, %v1822_v6  ;;  %v1809_v47 = vrot.slane %v1743_v51, 4  ;;  %v1811_v8 = vrot.slane %v1744_v37, 3  ;;  %v1813_v55 = vrot.slane %v1745_v25, 2 }
 0x29d   :  { %v1826_v41 = vsel %vm1365_vm5, %v1825_v50, %v1824_v26  ;;  %v1804_v27 = vsel %vm1357_vm1, %v1803_v12, %v1739_v22  ;;  %v1815_v3 = vrot.slane %v1746_v38, 1  ;;  %v1764_v54 = vmul.f32 %v3697_v62, %v3663_v24 }
 0x29e   :  { %v1828_v19 = vsel %vm1367_vm6, %v1827_v53, %v1826_v41  ;;  %v1806_v17 = vsel %vm1359_vm2, %v1805_v23, %v1804_v27  ;;  %v1765_v59 = vmul.f32 %v3700_v16, %v3667_v52  ;;  %v1766_v50 = vmul.f32 %v3703_v40, %v3669_v35 }
 0x29f   :  { %v1830_v14 = vsel %vm1369_vm7, %v1829_v2, %v1828_v19  ;;  %v1808_v39 = vsel %vm1361_vm3, %v1807_v28, %v1806_v17  ;;  %v1767_v22 = vmul.f32 %v3706_v56, %v3671_v33  ;;  %v1763_v36 = vmul.f32 %v3681_v45, %v3661_v61 }
 0x2a0   :  { %v1866_v53 = vsel %vm118_vm0, %v1830_v14, 0.0  ;;  %v1810_v13 = vsel %vm1363_vm4, %v1809_v47, %v1808_v39  ;;  %v1768_v51 = vmul.f32 %v3709_v43, %v3673_v34  ;;  %v1769_v17 = vmul.f32 %v3712_v44, %v3675_v30 }
 0x2a1   :  { %1867 = vadd.xlane.f32.xlu1 %v1866_v53  ;;  %v1812_v19 = vsel %vm1365_vm5, %v1811_v8, %v1810_v13  ;;  %v1845_v32 = vrot.slane %v1764_v54, 7  ;;  %v1847_v37 = vrot.slane %v1765_v59, 6  ;;  %v1770_v38 = vmul.f32 %v3715_v31, %v3677_v1 }
 0x2a2   :  { %v1814_v25 = vsel %vm1367_vm6, %v1813_v55, %v1812_v19  ;;  %v4059_v47 = vrot.slane %v3665_v20, 1  ;;  %v3786_v2 = vadd.f32 %v1253_v29, %v3679_v9  ;;  %v1849_v23 = vrot.slane %v1766_v50, 5 }
 0x2a3   :  { %v1816_v8 = vsel %vm1369_vm7, %v1815_v3, %v1814_v25  ;;  %v1846_v12 = vsel %vm1357_vm1, %v1845_v32, %v1763_v36  ;;  %v1851_v26 = vrot.slane %v1767_v22, 4  ;;  %v1853_v41 = vrot.slane %v1768_v51, 3 }
 0x2a4   :  { %v3783_v6 = vadd.f32 %v4059_v47, %v3665_v20  ;;  %v1863_v28 = vsel %vm118_vm0, %v1816_v8, 0.0  ;;  %v1848_v55 = vsel %vm1359_vm2, %v1847_v37, %v1846_v12  ;;  %v1756_v27 = vmul.f32 %v3697_v62, %v3685_v10 }
 0x2a5   :  { %1864 = vadd.xlane.f32.xlu0 %v1863_v28  ;;  %v1850_v20 = vsel %vm1361_vm3, %v1849_v23, %v1848_v55  ;;  %v1855_v54 = vrot.slane %v1769_v17, 2  ;;  %v1757_v9 = vmul.f32 %v3700_v16, %v3687_v46  ;;  %v1758_v3 = vmul.f32 %v3703_v40, %v3689_v15 }
 0x2a6   :  { %v1852_v29 = vsel %vm1363_vm4, %v1851_v26, %v1850_v20  ;;  %v1857_v59 = vrot.slane %v1770_v38, 1  ;;  %v1755_v14 = vmul.f32 %v3681_v45, %v3683_v5  ;;  %v1759_v39 = vmul.f32 %v3706_v56, %v3691_v60 }
 0x2a7   :  { %v1854_v62 = vsel %vm1365_vm5, %v1853_v41, %v1852_v29  ;;  %v1760_v50 = vmul.f32 %v3709_v43, %v3693_v4  ;;  %v1831_v22 = vrot.slane %v1756_v27, 7  ;;  %v1833_v53 = vrot.slane %v1757_v9, 6 }
 0x2a8   :  { %v1856_v16 = vsel %vm1367_vm6, %v1855_v54, %v1854_v62  ;;  %v1761_v40 = vmul.f32 %v3712_v44, %v3783_v6  ;;  %v1762_v45 = vmul.f32 %v3715_v31, %v3786_v2  ;;  %v1835_v56 = vrot.slane %v1758_v3, 5 }
 0x2a9   :  { %v1858_v13 = vsel %vm1369_vm7, %v1857_v59, %v1856_v16  ;;  %v1832_v36 = vsel %vm1357_vm1, %v1831_v22, %v1755_v14  ;;  %v1837_v43 = vrot.slane %v1759_v39, 4  ;;  %v1839_v32 = vrot.slane %v1760_v50, 3 }
 0x2aa   :  { %v1872_v51 = vsel %vm118_vm0, %v1858_v13, 0.0  ;;  %v1834_v19 = vsel %vm1359_vm2, %v1833_v53, %v1832_v36  ;;  %v1841_v44 = vrot.slane %v1761_v40, 2  ;;  %v1843_v38 = vrot.slane %v1762_v45, 1 }
 0x2ab   :  { %1873 = vadd.xlane.f32.xlu1 %v1872_v51  ;;  %v1836_v17 = vsel %vm1361_vm3, %v1835_v56, %v1834_v19  ;;  %v1937_v13 = vsel %vm1357_vm1, %v4057_v18, %v4058_v57  ;;  %v1930_v45 = vsel %vm1357_vm1, %v3590_v58, %v3586_v48  ;;  %v1944_v36 = vsel %vm1357_vm1, %v3685_v10, %v3683_v5  ;;  %v4060_v10 = vld [vmem:[#allocation2_spill] sm:$0xff]  ;;  %v4062_v57 = vld [vmem:[#allocation4_spill] sm:$0xff] }
 0x2ac   :  { %v1838_v37 = vsel %vm1363_vm4, %v1837_v43, %v1836_v17  ;;  %v1951_v56 = vsel %vm1357_vm1, %v3663_v24, %v3661_v61  ;;  %v1938_v19 = vsel %vm1359_vm2, %v3562_v0, %v1937_v13  ;;  %v1931_v43 = vsel %vm1359_vm2, %v3592_v21, %v1930_v45 }
 0x2ad   :  { %v1840_v25 = vsel %vm1365_vm5, %v1839_v32, %v1838_v37  ;;  %v1945_v18 = vsel %vm1359_vm2, %v3687_v46, %v1944_v36  ;;  %v1952_v48 = vsel %vm1359_vm2, %v3667_v52, %v1951_v56  ;;  %v1939_v58 = vsel %vm1361_vm3, %v3573_v11, %v1938_v19 }
 0x2ae   :  { %v1842_v31 = vsel %vm1367_vm6, %v1841_v44, %v1840_v25  ;;  %v1932_v61 = vsel %vm1361_vm3, %v3594_v49, %v1931_v43  ;;  %v1946_v24 = vsel %vm1361_vm3, %v3689_v15, %v1945_v18  ;;  %v1953_v0 = vsel %vm1361_vm3, %v3669_v35, %v1952_v48  ;;  %v4061_v15 = vld [vmem:[#allocation6_spill] sm:$0xff]  ;;  %v4063_v25 = vld [vmem:[#allocation9_spill] sm:$0xff] }
 0x2af   :  { %v1844_v47 = vsel %vm1369_vm7, %v1843_v38, %v1842_v31  ;;  %v1940_v21 = vsel %vm1363_vm4, %v3577_v7, %v1939_v58  ;;  %v1933_v5 = vsel %vm1363_vm4, %v3596_v63, %v1932_v61  ;;  %v1947_v52 = vsel %vm1363_vm4, %v3691_v60, %v1946_v24  ;;  %v4064_v38 = vld [vmem:[#allocation20_spill] sm:$0xff] }
 0x2b0   :  { %v1869_v8 = vsel %vm118_vm0, %v1844_v47, 0.0  ;;  %v1954_v11 = vsel %vm1363_vm4, %v3671_v33, %v1953_v0  ;;  %v1941_v49 = vsel %vm1365_vm5, %v3579_v42, %v1940_v21  ;;  %v1934_v46 = vsel %vm1365_vm5, %v4060_v10, %v1933_v5 }
 0x2b1   :  { %1870 = vadd.xlane.f32.xlu0 %v1869_v8  ;;  %v1948_v35 = vsel %vm1365_vm5, %v3693_v4, %v1947_v52  ;;  %v1955_v7 = vsel %vm1365_vm5, %v3673_v34, %v1954_v11  ;;  %v1942_v63 = vsel %vm1367_vm6, %v4061_v15, %v1941_v49  ;;  %v1935_v60 = vsel %vm1367_vm6, %v4062_v57, %v1934_v46 }
 0x2b2   :  { %v1949_v33 = vsel %vm1367_vm6, %v3783_v6, %v1948_v35  ;;  %v1956_v42 = vsel %vm1367_vm6, %v3675_v30, %v1955_v7  ;;  %v1943_v34 = vsel %vm1369_vm7, %v4063_v25, %v1942_v63  ;;  %v1936_v31 = vsel %vm1369_vm7, %v4064_v38, %v1935_v60 }
 0x2b3   :  { %v1950_v47 = vsel %vm1369_vm7, %v3786_v2, %v1949_v33 }
 0x32a   :  { %v1868_v12 = vpop.xlane.xlu1 %1867 }
 0x32e   :  { %v1865_v23 = vpop.xlane.xlu0 %1864 }
 0x32f   :  { %v1875_v55 = vmax.f32 %v1865_v23, %v1868_v12 }
 0x334   :  { %v1874_v26 = vpop.xlane.xlu1 %1873 }
 0x33a   :  { %v1871_v28 = vpop.xlane.xlu0 %1870 }
 0x33b   :  { %v1876_v41 = vmax.f32 %v1871_v28, %v1874_v26 }
 0x33d   :  { %v1877_v27 = vmax.f32 %v1875_v55, %v1876_v41 }
 0x33f   :  { %v1878_v20 = vsub.f32 %v1865_v23, %v1877_v27  ;;  %v1879_v54 = vsub.f32 %v1868_v12, %v1877_v27  ;;  %v1880_v9 = vsub.f32 %v1871_v28, %v1877_v27  ;;  %v1881_v3 = vsub.f32 %v1874_v26, %v1877_v27 }
 0x340   :  { %v1957_v23 = vsel %vm1369_vm7, %v3677_v1, %v1956_v42 }
 0x341   :  { %v1882_v29 = vmul.f32 1.442695, %v1878_v20  ;;  %v1884_v59 = vmul.f32 1.442695, %v1879_v54  ;;  %v1886_v14 = vmul.f32 1.442695, %v1880_v9 }
 0x342   :  { %v1888_v39 = vmul.f32 1.442695, %v1881_v3  ;;  %v4065_v9 = vld [vmem:[#allocation12_spill] sm:$0xff] }
 0x343   :  { %2400 = vpow2.f32 %v1882_v29 }
 0x344   :  { %2402 = vpow2.f32 %v1884_v59 }
 0x345   :  { %2404 = vpow2.f32 %v1886_v14 }
 0x346   :  { %2406 = vpow2.f32 %v1888_v39 }
 0x350   :  { %v2401_v62 = vpop.eup %2400 }
 0x351   :  { %v2403_v50 = vpop.eup %2402 }
 0x352   :  { %v1890_v22 = vadd.f32 %v2403_v50, %v2401_v62  ;;  %v2405_v53 = vpop.eup %2404 }
 0x353   :  { %v2407_v40 = vpop.eup %2406 }
 0x354   :  { %v1891_v16 = vadd.f32 %v2405_v53, %v1890_v22 }
 0x356   :  { %v1892_v51 = vadd.f32 %v2407_v40, %v1891_v16 }
 0x358   :  { %2408 = vrcp.f32 %v1892_v51 }
 0x365   :  { %v2409_v17 = vpop.eup %2408 }
 0x366   :  { %v1894_v32 = vmul.f32 %v2409_v17, %v2401_v62  ;;  %v1895_v37 = vmul.f32 %v2409_v17, %v2403_v50  ;;  %v1896_v44 = vmul.f32 %v2409_v17, %v2405_v53  ;;  %v1897_v4 = vmul.f32 %v2409_v17, %v2407_v40 }
 0x368   :  { %v1962_v8 = vmul.f32 %v1936_v31, %v1894_v32  ;;  %v1963_v12 = vmul.f32 %v1943_v34, %v1895_v37  ;;  %v1964_v6 = vmul.f32 %v1950_v47, %v1896_v44  ;;  %v1965_v30 = vmul.f32 %v1957_v23, %v1897_v4 }
 0x36a   :  { %v1966_v26 = vsel %vm118_vm0, %v1962_v8, 0.0  ;;  %v1967_v28 = vsel %vm118_vm0, %v1963_v12, 0.0  ;;  %v1969_v41 = vsel %vm118_vm0, %v1964_v6, 0.0  ;;  %v1971_v20 = vsel %vm118_vm0, %v1965_v30, 0.0 }
 0x36b   :  { %v1968_v55 = vadd.f32 %v1967_v28, %v1966_v26 }
 0x36d   :  { %v1970_v27 = vadd.f32 %v1969_v41, %v1968_v55 }
 0x36f   :  { %v1972_v54 = vadd.f32 %v1971_v20, %v1970_v27 }
 0x371   :  { %v1974_v2 = vadd.f32 %v1972_v54, %v4065_v9 }
 0x373   :  { %1975 = vst.msk [vmem:[%s3897_s6] sm:$0xff] %vm118_vm0, %v1974_v2 }

</bundles_post_ra>
